<compile_context>
chip_gen: v6e
topology: v6e:2x2x1
jax: 0.10.0
libtpu: 0.0.40
codegen_flags: <defaults>
</compile_context>

<pallas_src>
import functools

import jax
import jax.numpy as jnp
from jax.experimental import pallas as pl
from jax.experimental.pallas import tpu as pltpu


# ----------------------------- in-kernel helpers -----------------------------
def _sigmoid(v):
    # numerically stable sigmoid; tanh issues on the EUP slot
    return 0.5 * (jnp.tanh(0.5 * v) + 1.0)


def _softplus(v):
    return jnp.maximum(v, 0.0) + jnp.log1p(jnp.exp(-jnp.abs(v)))


def _softmax(v, axis):
    e = jnp.exp(v - jnp.max(v, axis=axis, keepdims=True))
    return e * pl.reciprocal(jnp.sum(e, axis=axis, keepdims=True), approx=True)


def _address(sim, beta_r, g_r, s_r, gamma_r, w_prev):
    """NTM addressing given a precomputed cosine similarity `sim` [B, N]."""
    beta = _softplus(beta_r)               # [B,1]
    g = _sigmoid(g_r)                      # [B,1]
    s = _softmax(s_r, axis=1)              # [B,3]
    gamma = 1.0 + _softplus(gamma_r)       # [B,1]
    wc = _softmax(beta * sim, axis=1)      # content weights [B,N]
    wg = g * wc + (1.0 - g) * w_prev       # interpolation
    # circular convolution with 3-tap shift kernel s = [s_-1, s_0, s_+1]
    w_m1 = jnp.concatenate([wg[:, -1:], wg[:, :-1]], axis=1)   # out[i] = wg[(i-1)%N]
    w_p1 = jnp.concatenate([wg[:, 1:], wg[:, :1]], axis=1)     # out[i] = wg[(i+1)%N]
    w_hat = s[:, 0:1] * w_m1 + s[:, 1:2] * wg + s[:, 2:3] * w_p1
    # sharpen: w_hat ** gamma  (clamped log -> robust to exact zeros)
    w_pow = jnp.exp(gamma * jnp.log(jnp.maximum(w_hat, 1e-16)))
    return w_pow * pl.reciprocal(
        jnp.sum(w_pow, axis=1, keepdims=True) + 1e-16, approx=True)


# --------------------------------- kernel ------------------------------------
def _ntm_seq_kernel(
    x_ref, state_in_ref, mem_in_ref,
    w_lstm_ref, b_lstm_ref, w_heads_ref, b_heads_ref, w_fc_ref, b_fc_ref,
    o_ref, state_out_ref, mem_out_ref,
    r_s, h_s, c_s, wr_s, ww_s, mem_s,
    *, M, H, N,
):
    f32 = jnp.float32
    t = pl.program_id(0)

    # unpack the initial packed state into the carried VMEM scratch at t == 0
    @pl.when(t == 0)
    def _init():
        st = state_in_ref[...]
        r_s[...] = st[:, 0:M]
        h_s[...] = st[:, M:M + H]
        c_s[...] = st[:, M + H:M + 2 * H]
        wr_s[...] = st[:, M + 2 * H:M + 2 * H + N]
        ww_s[...] = st[:, M + 2 * H + N:M + 2 * H + 2 * N]
        mem_s[...] = mem_in_ref[...]

    x = x_ref[0]                  # [B, I]
    r_prev = r_s[...]
    h_prev = h_s[...]
    c_prev = c_s[...]
    mem = mem_s[...]              # [B, N, M] pre-write memory

    # ------ LSTM controller: single fused matmul over cat([x, r_prev, h_prev]) -
    inp = jnp.concatenate([x, r_prev, h_prev], axis=1)            # [B, I+M+H]
    gates = jnp.dot(inp, w_lstm_ref[...], preferred_element_type=f32) + b_lstm_ref[...]
    i_g = _sigmoid(gates[:, 0:H])
    f_g = _sigmoid(gates[:, H:2 * H])
    g_g = jnp.tanh(gates[:, 2 * H:3 * H])
    o_g = _sigmoid(gates[:, 3 * H:4 * H])
    c_new = f_g * c_prev + i_g * g_g
    h_new = o_g * jnp.tanh(c_new)

    # ------ both heads' FC fused into one matmul --------------------------------
    head_out = jnp.dot(h_new, w_heads_ref[...], preferred_element_type=f32) + b_heads_ref[...]
    o_r = head_out[:, 0:M + 6]              # read-head params
    o_w = head_out[:, M + 6:4 * M + 12]     # write-head params

    # ------ shared content addressing (both heads see pre-write memory) ---------
    mem_e = mem + 1e-16
    k_both = jnp.stack([o_r[:, 0:M], o_w[:, 0:M]], axis=1) + 1e-16      # [B,2,M]
    dots = jnp.einsum('bkm,bnm->bkn', k_both, mem_e,
                      preferred_element_type=f32)                        # [B,2,N]
    nm = jnp.sqrt(jnp.sum(mem_e * mem_e, axis=-1))                       # [B,N] (once)
    nk = jnp.sqrt(jnp.sum(k_both * k_both, axis=-1))                     # [B,2]
    denom = jnp.maximum(nk[:, :, None] * nm[:, None, :], 1e-8)           # [B,2,N]
    sim = dots * pl.reciprocal(denom, approx=True)

    # ------ read head (reads pre-write memory) ----------------------------------
    w_read = _address(sim[:, 0, :], o_r[:, M:M + 1], o_r[:, M + 1:M + 2],
                      o_r[:, M + 2:M + 5], o_r[:, M + 5:M + 6], wr_s[...])
    r_new = jnp.sum(w_read[:, :, None] * mem, axis=1)                    # [B,M]

    # ------ write head: erase / add ----------------------------------------------
    w_write = _address(sim[:, 1, :], o_w[:, M:M + 1], o_w[:, M + 1:M + 2],
                       o_w[:, M + 2:M + 5], o_w[:, M + 5:M + 6], ww_s[...])
    e_gate = _sigmoid(o_w[:, M + 6:2 * M + 6])
    a_vec = o_w[:, 2 * M + 6:3 * M + 6]
    mem_new = (mem * (1.0 - w_write[:, :, None] * e_gate[:, None, :])
               + w_write[:, :, None] * a_vec[:, None, :])

    # ------ external output: sigmoid(fc(cat([h, r]))), one fused matmul ----------
    out_in = jnp.concatenate([h_new, r_new], axis=1)                     # [B, H+M]
    logits = jnp.dot(out_in, w_fc_ref[...], preferred_element_type=f32) + b_fc_ref[...]
    o_ref[0] = _sigmoid(logits)

    # ------ carry state in VMEM scratch ------------------------------------------
    r_s[...] = r_new
    h_s[...] = h_new
    c_s[...] = c_new
    wr_s[...] = w_read
    ww_s[...] = w_write
    mem_s[...] = mem_new

    # ------ write final state back to HBM once, lane-packed ----------------------
    @pl.when(t == pl.num_programs(0) - 1)
    def _final():
        state_out_ref[...] = jnp.concatenate(
            [r_new, h_new, c_new, w_read, w_write], axis=1)
        mem_out_ref[...] = mem_new


# -------------------------------- wrappers -----------------------------------
def ntm_forward_seq(xs, state, params):
    """Run T NTM steps in one fused pallas_call.

    xs: [T, B, num_inputs] (time-major).
    state = (r, h, c, w_read, w_write, memory).
    Returns (o_seq [T, B, num_outputs], new_state).
    """
    r0, h0, c0, wr0, ww0, mem0 = state
    T, B, I = xs.shape
    M = r0.shape[1]
    H = h0.shape[1]
    N = mem0.shape[1]
    O = params["b_fc"].shape[1]
    S = M + 2 * H + 2 * N

    # Pack small state tensors into one lane-dense slab; pre-fuse weights so the
    # kernel does 3 fused matmuls per step (one-time XLA concats under jit).
    state_in = jnp.concatenate([r0, h0, c0, wr0, ww0], axis=1)                      # [B,S]
    w_lstm = jnp.concatenate([params["w_ih_x"], params["w_ih_r"], params["w_hh"]], axis=0)
    w_heads = jnp.concatenate([params["w_read"], params["w_write"]], axis=1)
    b_heads = jnp.concatenate([params["b_read"], params["b_write"]], axis=1)
    w_fc = jnp.concatenate([params["w_fc_h"], params["w_fc_r"]], axis=0)

    def const_spec(shape):
        ndim = len(shape)
        return pl.BlockSpec(shape, lambda t: (0,) * ndim)   # VMEM-resident across T

    grid_spec = pltpu.PrefetchScalarGridSpec(
        num_scalar_prefetch=0,
        grid=(T,),
        in_specs=[
            pl.BlockSpec((1, B, I), lambda t: (t, 0, 0)),     # xs streamed over T
            const_spec((B, S)),                               # packed initial state
            const_spec((B, N, M)),                            # initial memory
            const_spec(w_lstm.shape), const_spec(params["b_lstm"].shape),
            const_spec(w_heads.shape), const_spec(b_heads.shape),
            const_spec(w_fc.shape), const_spec(params["b_fc"].shape),
        ],
        out_specs=(
            pl.BlockSpec((1, B, O), lambda t: (t, 0, 0)),     # per-step output
            const_spec((B, S)),                               # final packed state
            const_spec((B, N, M)),                            # final memory
        ),
        scratch_shapes=[
            pltpu.VMEM((B, M), jnp.float32),     # r
            pltpu.VMEM((B, H), jnp.float32),     # h
            pltpu.VMEM((B, H), jnp.float32),     # c
            pltpu.VMEM((B, N), jnp.float32),     # w_read
            pltpu.VMEM((B, N), jnp.float32),     # w_write
            pltpu.VMEM((B, N, M), jnp.float32),  # memory
        ],
    )
    out_shape = (
        jax.ShapeDtypeStruct((T, B, O), jnp.float32),
        jax.ShapeDtypeStruct((B, S), jnp.float32),
        jax.ShapeDtypeStruct((B, N, M), jnp.float32),
    )
    kernel = functools.partial(_ntm_seq_kernel, M=M, H=H, N=N)
    o_seq, state_out, mem_out = pl.pallas_call(
        kernel,
        grid_spec=grid_spec,
        out_shape=out_shape,
        compiler_params=pltpu.CompilerParams(
            dimension_semantics=("arbitrary",),   # sequential state carry over T
            vmem_limit_bytes=32 * 1024 * 1024,    # explicit budget (fits v7x's 64 MiB)
        ),
    )(xs, state_in, mem0, w_lstm, params["b_lstm"], w_heads, b_heads,
      w_fc, params["b_fc"])

    new_state = (
        state_out[:, 0:M],
        state_out[:, M:M + H],
        state_out[:, M + H:M + 2 * H],
        state_out[:, M + 2 * H:M + 2 * H + N],
        state_out[:, M + 2 * H + N:],
        mem_out,
    )
    return o_seq, new_state


def ntm_forward(x, state, params):
    """One NTM step (same semantics as the PyTorch module's forward)."""
    o_seq, new_state = ntm_forward_seq(x[None], state, params)
    return o_seq[0], new_state


def init_ntm(key, num_inputs, num_outputs, N, M, H, batch_size):
    """Deterministic synthetic parameter + initial-state construction."""
    ks = jax.random.split(key, 16)

    def xavier(k, shape, gain=1.0):   # shape = (in_features, out_features)
        bound = gain * (6.0 / (shape[0] + shape[1])) ** 0.5
        return jax.random.uniform(k, shape, jnp.float32, -bound, bound)

    params = dict(
        w_ih_x=0.1 * jax.random.normal(ks[0], (num_inputs, 4 * H), jnp.float32),
        w_ih_r=0.1 * jax.random.normal(ks[1], (M, 4 * H), jnp.float32),
        w_hh=0.1 * jax.random.normal(ks[2], (H, 4 * H), jnp.float32),
        b_lstm=0.01 * jax.random.normal(ks[3], (1, 4 * H), jnp.float32),  # b_ih + b_hh folded
        w_read=xavier(ks[4], (H, M + 6), gain=1.4),
        b_read=0.01 * jax.random.normal(ks[5], (1, M + 6), jnp.float32),
        w_write=xavier(ks[6], (H, 3 * M + 6), gain=1.4),
        b_write=0.01 * jax.random.normal(ks[7], (1, 3 * M + 6), jnp.float32),
        w_fc_h=xavier(ks[8], (H, num_outputs)),
        w_fc_r=xavier(ks[9], (M, num_outputs)),
        b_fc=0.01 * jax.random.normal(ks[10], (1, num_outputs), jnp.float32),
    )
    stdev = 1.0 / (N + M) ** 0.5
    mem0 = jax.random.uniform(ks[11], (N, M), jnp.float32, -stdev, stdev)
    state = (
        jnp.tile(0.01 * jax.random.normal(ks[12], (1, M), jnp.float32), (batch_size, 1)),
        jnp.tile(0.05 * jax.random.normal(ks[13], (1, H), jnp.float32), (batch_size, 1)),
        jnp.tile(0.05 * jax.random.normal(ks[14], (1, H), jnp.float32), (batch_size, 1)),
        jnp.zeros((batch_size, N), jnp.float32),   # read-head prev weights
        jnp.zeros((batch_size, N), jnp.float32),   # write-head prev weights
        jnp.tile(mem0[None], (batch_size, 1, 1)),  # memory
    )
    return params, state


if __name__ == "__main__":
    B, I, O, N, M, H, T = 2, 8, 8, 16, 16, 32, 8
    key = jax.random.PRNGKey(0)
    k_param, k_x = jax.random.split(key)
    params, state = init_ntm(k_param, I, O, N, M, H, B)
    xs = jax.random.normal(k_x, (T, B, I), jnp.float32)   # time-major sequence

    o_seq, new_state = jax.jit(ntm_forward_seq)(xs, state, params)
    jax.block_until_ready((o_seq, new_state))

    assert o_seq.shape == (T, B, O)
    assert new_state[-1].shape == (B, N, M)
    assert bool(jnp.all(jnp.isfinite(o_seq)))
    assert bool(jnp.all(jnp.isfinite(new_state[-1])))
    print("KERNEL_OK")
</pallas_src>

<mosaic_0001>
module attributes {stable_mosaic.version = 11 : i64} {
  func.func @_ntm_seq_kernel(%arg0: i32, %arg1: memref<1x2x8xf32, #tpu.memory_space<vmem>>, %arg2: memref<2x112xf32, #tpu.memory_space<vmem>>, %arg3: memref<2x16x16xf32, #tpu.memory_space<vmem>>, %arg4: memref<56x128xf32, #tpu.memory_space<vmem>>, %arg5: memref<1x128xf32, #tpu.memory_space<vmem>>, %arg6: memref<32x76xf32, #tpu.memory_space<vmem>>, %arg7: memref<1x76xf32, #tpu.memory_space<vmem>>, %arg8: memref<48x8xf32, #tpu.memory_space<vmem>>, %arg9: memref<1x8xf32, #tpu.memory_space<vmem>>, %arg10: memref<1x2x8xf32, #tpu.memory_space<vmem>>, %arg11: memref<2x112xf32, #tpu.memory_space<vmem>>, %arg12: memref<2x16x16xf32, #tpu.memory_space<vmem>>, %arg13: memref<2x16xf32, #tpu.memory_space<vmem>>, %arg14: memref<2x32xf32, #tpu.memory_space<vmem>>, %arg15: memref<2x32xf32, #tpu.memory_space<vmem>>, %arg16: memref<2x16xf32, #tpu.memory_space<vmem>>, %arg17: memref<2x16xf32, #tpu.memory_space<vmem>>, %arg18: memref<2x16x16xf32, #tpu.memory_space<vmem>>) attributes {dimension_semantics = [#tpu.dimension_semantics<arbitrary>], iteration_bounds = array<i64: 8>, scalar_prefetch = 0 : i64, scratch_operands = 6 : i64, tpu.core_type = #tpu.core_type<tc>, window_params = [{transform_indices = @transform_0, window_bounds = array<i64: 1, 2, 8>}, {pipeline_mode = #tpu.pipeline_mode<synchronous>, transform_indices = @transform_1, window_bounds = array<i64: 2, 112>}, {pipeline_mode = #tpu.pipeline_mode<synchronous>, transform_indices = @transform_2, window_bounds = array<i64: 2, 16, 16>}, {pipeline_mode = #tpu.pipeline_mode<synchronous>, transform_indices = @transform_3, window_bounds = array<i64: 56, 128>}, {pipeline_mode = #tpu.pipeline_mode<synchronous>, transform_indices = @transform_4, window_bounds = array<i64: 1, 128>}, {pipeline_mode = #tpu.pipeline_mode<synchronous>, transform_indices = @transform_5, window_bounds = array<i64: 32, 76>}, {pipeline_mode = #tpu.pipeline_mode<synchronous>, transform_indices = @transform_6, window_bounds = array<i64: 1, 76>}, {pipeline_mode = #tpu.pipeline_mode<synchronous>, transform_indices = @transform_7, window_bounds = array<i64: 48, 8>}, {pipeline_mode = #tpu.pipeline_mode<synchronous>, transform_indices = @transform_8, window_bounds = array<i64: 1, 8>}, {transform_indices = @transform_9, window_bounds = array<i64: 1, 2, 8>}, {pipeline_mode = #tpu.pipeline_mode<synchronous>, transform_indices = @transform_10, window_bounds = array<i64: 2, 112>}, {pipeline_mode = #tpu.pipeline_mode<synchronous>, transform_indices = @transform_11, window_bounds = array<i64: 2, 16, 16>}]} {
    %c0_i32 = arith.constant 0 : i32
    %0 = arith.cmpi eq, %arg0, %c0_i32 : i32
    %1 = arith.extui %0 : i1 to i32
    %c0_i32_0 = arith.constant 0 : i32
    %2 = arith.cmpi ne, %1, %c0_i32_0 : i32
    scf.if %2 {
      %c0_102 = arith.constant 0 : index
      %c0_103 = arith.constant 0 : index
      %312 = vector.load %arg2[%c0_102, %c0_103] : memref<2x112xf32, #tpu.memory_space<vmem>>, vector<2x112xf32>
      %313 = vector.extract_strided_slice %312 {offsets = [0, 0], sizes = [2, 16], strides = [1, 1]} : vector<2x112xf32> to vector<2x16xf32>
      %c0_104 = arith.constant 0 : index
      %c0_105 = arith.constant 0 : index
      %314 = vector.load %arg13[%c0_104, %c0_105] : memref<2x16xf32, #tpu.memory_space<vmem>>, vector<2x16xf32>
      tpu.vector_store %arg13[%c0_104, %c0_105], %313 {strides = array<i32>} : memref<2x16xf32, #tpu.memory_space<vmem>>, vector<2x16xf32>,
      %315 = vector.extract_strided_slice %312 {offsets = [0, 16], sizes = [2, 32], strides = [1, 1]} : vector<2x112xf32> to vector<2x32xf32>
      %c0_106 = arith.constant 0 : index
      %c0_107 = arith.constant 0 : index
      %316 = vector.load %arg14[%c0_106, %c0_107] : memref<2x32xf32, #tpu.memory_space<vmem>>, vector<2x32xf32>
      tpu.vector_store %arg14[%c0_106, %c0_107], %315 {strides = array<i32>} : memref<2x32xf32, #tpu.memory_space<vmem>>, vector<2x32xf32>,
      %317 = vector.extract_strided_slice %312 {offsets = [0, 48], sizes = [2, 32], strides = [1, 1]} : vector<2x112xf32> to vector<2x32xf32>
      %c0_108 = arith.constant 0 : index
      %c0_109 = arith.constant 0 : index
      %318 = vector.load %arg15[%c0_108, %c0_109] : memref<2x32xf32, #tpu.memory_space<vmem>>, vector<2x32xf32>
      tpu.vector_store %arg15[%c0_108, %c0_109], %317 {strides = array<i32>} : memref<2x32xf32, #tpu.memory_space<vmem>>, vector<2x32xf32>,
      %319 = vector.extract_strided_slice %312 {offsets = [0, 80], sizes = [2, 16], strides = [1, 1]} : vector<2x112xf32> to vector<2x16xf32>
      %c0_110 = arith.constant 0 : index
      %c0_111 = arith.constant 0 : index
      %320 = vector.load %arg16[%c0_110, %c0_111] : memref<2x16xf32, #tpu.memory_space<vmem>>, vector<2x16xf32>
      tpu.vector_store %arg16[%c0_110, %c0_111], %319 {strides = array<i32>} : memref<2x16xf32, #tpu.memory_space<vmem>>, vector<2x16xf32>,
      %321 = vector.extract_strided_slice %312 {offsets = [0, 96], sizes = [2, 16], strides = [1, 1]} : vector<2x112xf32> to vector<2x16xf32>
      %c0_112 = arith.constant 0 : index
      %c0_113 = arith.constant 0 : index
      %322 = vector.load %arg17[%c0_112, %c0_113] : memref<2x16xf32, #tpu.memory_space<vmem>>, vector<2x16xf32>
      tpu.vector_store %arg17[%c0_112, %c0_113], %321 {strides = array<i32>} : memref<2x16xf32, #tpu.memory_space<vmem>>, vector<2x16xf32>,
      %c0_114 = arith.constant 0 : index
      %c0_115 = arith.constant 0 : index
      %c0_116 = arith.constant 0 : index
      %323 = vector.load %arg3[%c0_114, %c0_115, %c0_116] : memref<2x16x16xf32, #tpu.memory_space<vmem>>, vector<2x16x16xf32>
      %c0_117 = arith.constant 0 : index
      %c0_118 = arith.constant 0 : index
      %c0_119 = arith.constant 0 : index
      %324 = vector.load %arg18[%c0_117, %c0_118, %c0_119] : memref<2x16x16xf32, #tpu.memory_space<vmem>>, vector<2x16x16xf32>
      tpu.vector_store %arg18[%c0_117, %c0_118, %c0_119], %323 {strides = array<i32>} : memref<2x16x16xf32, #tpu.memory_space<vmem>>, vector<2x16x16xf32>,
    } else {
    }
    %c0 = arith.constant 0 : index
    %c0_1 = arith.constant 0 : index
    %c0_2 = arith.constant 0 : index
    %3 = vector.load %arg1[%c0, %c0_1, %c0_2] : memref<1x2x8xf32, #tpu.memory_space<vmem>>, vector<1x2x8xf32>
    %4 = vector.shape_cast %3 : vector<1x2x8xf32> to vector<2x8xf32>
    %c0_3 = arith.constant 0 : index
    %c0_4 = arith.constant 0 : index
    %5 = vector.load %arg13[%c0_3, %c0_4] : memref<2x16xf32, #tpu.memory_space<vmem>>, vector<2x16xf32>
    %c0_5 = arith.constant 0 : index
    %c0_6 = arith.constant 0 : index
    %6 = vector.load %arg14[%c0_5, %c0_6] : memref<2x32xf32, #tpu.memory_space<vmem>>, vector<2x32xf32>
    %c0_7 = arith.constant 0 : index
    %c0_8 = arith.constant 0 : index
    %7 = vector.load %arg15[%c0_7, %c0_8] : memref<2x32xf32, #tpu.memory_space<vmem>>, vector<2x32xf32>
    %c0_9 = arith.constant 0 : index
    %c0_10 = arith.constant 0 : index
    %c0_11 = arith.constant 0 : index
    %8 = vector.load %arg18[%c0_9, %c0_10, %c0_11] : memref<2x16x16xf32, #tpu.memory_space<vmem>>, vector<2x16x16xf32>
    %9 = tpu.concatenate %4, %5, %6 in 1 : vector<2x8xf32>, vector<2x16xf32>, vector<2x32xf32> -> vector<2x56xf32>
    %c0_12 = arith.constant 0 : index
    %c0_13 = arith.constant 0 : index
    %10 = vector.load %arg4[%c0_12, %c0_13] : memref<56x128xf32, #tpu.memory_space<vmem>>, vector<56x128xf32>
    %cst = arith.constant dense<0.000000e+00> : vector<2x128xf32>
    %11 = tpu.matmul %9, %10, %cst {dimension_numbers = #tpu.dot_dimension_numbers<[1], [0], [0], [1], [0, 0, 1, 1], [], []>} : vector<2x56xf32>, vector<56x128xf32>, vector<2x128xf32> -> vector<2x128xf32>
    %c0_14 = arith.constant 0 : index
    %c0_15 = arith.constant 0 : index
    %12 = vector.load %arg5[%c0_14, %c0_15] : memref<1x128xf32, #tpu.memory_space<vmem>>, vector<1x128xf32>
    %13 = vector.broadcast %12 : vector<1x128xf32> to vector<2x128xf32>
    %14 = arith.addf %11, %13 : vector<2x128xf32>
    %15 = vector.extract_strided_slice %14 {offsets = [0, 0], sizes = [2, 32], strides = [1, 1]} : vector<2x128xf32> to vector<2x32xf32>
    %cst_16 = arith.constant 5.000000e-01 : f32
    %16 = vector.broadcast %cst_16 : f32 to vector<2x32xf32>
    %17 = arith.mulf %16, %15 : vector<2x32xf32>
    %18 = math.tanh %17 : vector<2x32xf32>
    %cst_17 = arith.constant 1.000000e+00 : f32
    %19 = vector.broadcast %cst_17 : f32 to vector<2x32xf32>
    %20 = arith.addf %18, %19 : vector<2x32xf32>
    %cst_18 = arith.constant 5.000000e-01 : f32
    %21 = vector.broadcast %cst_18 : f32 to vector<2x32xf32>
    %22 = arith.mulf %21, %20 : vector<2x32xf32>
    %23 = vector.extract_strided_slice %14 {offsets = [0, 32], sizes = [2, 32], strides = [1, 1]} : vector<2x128xf32> to vector<2x32xf32>
    %cst_19 = arith.constant 5.000000e-01 : f32
    %24 = vector.broadcast %cst_19 : f32 to vector<2x32xf32>
    %25 = arith.mulf %24, %23 : vector<2x32xf32>
    %26 = math.tanh %25 : vector<2x32xf32>
    %cst_20 = arith.constant 1.000000e+00 : f32
    %27 = vector.broadcast %cst_20 : f32 to vector<2x32xf32>
    %28 = arith.addf %26, %27 : vector<2x32xf32>
    %cst_21 = arith.constant 5.000000e-01 : f32
    %29 = vector.broadcast %cst_21 : f32 to vector<2x32xf32>
    %30 = arith.mulf %29, %28 : vector<2x32xf32>
    %31 = vector.extract_strided_slice %14 {offsets = [0, 64], sizes = [2, 32], strides = [1, 1]} : vector<2x128xf32> to vector<2x32xf32>
    %32 = math.tanh %31 : vector<2x32xf32>
    %33 = vector.extract_strided_slice %14 {offsets = [0, 96], sizes = [2, 32], strides = [1, 1]} : vector<2x128xf32> to vector<2x32xf32>
    %cst_22 = arith.constant 5.000000e-01 : f32
    %34 = vector.broadcast %cst_22 : f32 to vector<2x32xf32>
    %35 = arith.mulf %34, %33 : vector<2x32xf32>
    %36 = math.tanh %35 : vector<2x32xf32>
    %cst_23 = arith.constant 1.000000e+00 : f32
    %37 = vector.broadcast %cst_23 : f32 to vector<2x32xf32>
    %38 = arith.addf %36, %37 : vector<2x32xf32>
    %cst_24 = arith.constant 5.000000e-01 : f32
    %39 = vector.broadcast %cst_24 : f32 to vector<2x32xf32>
    %40 = arith.mulf %39, %38 : vector<2x32xf32>
    %41 = arith.mulf %30, %7 : vector<2x32xf32>
    %42 = arith.mulf %22, %32 : vector<2x32xf32>
    %43 = arith.addf %41, %42 : vector<2x32xf32>
    %44 = math.tanh %43 : vector<2x32xf32>
    %45 = arith.mulf %40, %44 : vector<2x32xf32>
    %c0_25 = arith.constant 0 : index
    %c0_26 = arith.constant 0 : index
    %46 = vector.load %arg6[%c0_25, %c0_26] : memref<32x76xf32, #tpu.memory_space<vmem>>, vector<32x76xf32>
    %cst_27 = arith.constant dense<0.000000e+00> : vector<2x76xf32>
    %47 = tpu.matmul %45, %46, %cst_27 {dimension_numbers = #tpu.dot_dimension_numbers<[1], [0], [0], [1], [0, 0, 1, 1], [], []>} : vector<2x32xf32>, vector<32x76xf32>, vector<2x76xf32> -> vector<2x76xf32>
    %c0_28 = arith.constant 0 : index
    %c0_29 = arith.constant 0 : index
    %48 = vector.load %arg7[%c0_28, %c0_29] : memref<1x76xf32, #tpu.memory_space<vmem>>, vector<1x76xf32>
    %49 = vector.broadcast %48 : vector<1x76xf32> to vector<2x76xf32>
    %50 = arith.addf %47, %49 : vector<2x76xf32>
    %51 = vector.extract_strided_slice %50 {offsets = [0, 0], sizes = [2, 22], strides = [1, 1]} : vector<2x76xf32> to vector<2x22xf32>
    %52 = vector.extract_strided_slice %50 {offsets = [0, 22], sizes = [2, 54], strides = [1, 1]} : vector<2x76xf32> to vector<2x54xf32>
    %cst_30 = arith.constant 1.000000e-16 : f32
    %53 = vector.broadcast %cst_30 : f32 to vector<2x16x16xf32>
    %54 = arith.addf %8, %53 : vector<2x16x16xf32>
    %55 = vector.extract_strided_slice %51 {offsets = [0, 0], sizes = [2, 16], strides = [1, 1]} : vector<2x22xf32> to vector<2x16xf32>
    %56 = vector.extract_strided_slice %52 {offsets = [0, 0], sizes = [2, 16], strides = [1, 1]} : vector<2x54xf32> to vector<2x16xf32>
    %57 = vector.shape_cast %55 : vector<2x16xf32> to vector<2x1x16xf32>
    %58 = vector.shape_cast %56 : vector<2x16xf32> to vector<2x1x16xf32>
    %59 = tpu.concatenate %57, %58 in 1 : vector<2x1x16xf32>, vector<2x1x16xf32> -> vector<2x2x16xf32>
    %cst_31 = arith.constant 1.000000e-16 : f32
    %60 = vector.broadcast %cst_31 : f32 to vector<2x2x16xf32>
    %61 = arith.addf %59, %60 : vector<2x2x16xf32>
    "tpu.trace_start"() <{level = 10 : i32, message = "bkm,bnm->bkn"}> : () -> ()
    %cst_32 = arith.constant dense<0.000000e+00> : vector<2x2x16xf32>
    %62 = tpu.matmul %61, %54, %cst_32 {dimension_numbers = #tpu.dot_dimension_numbers<[2], [2], [1], [1], [0, 0, 0, 1, 1, 1], [0], [0]>} : vector<2x2x16xf32>, vector<2x16x16xf32>, vector<2x2x16xf32> -> vector<2x2x16xf32>
    "tpu.trace_stop"() : () -> ()
    %63 = arith.mulf %54, %54 : vector<2x16x16xf32>
    %cst_33 = arith.constant dense<0.000000e+00> : vector<2x16xf32>
    %64 = vector.multi_reduction <add>, %63, %cst_33 [2] : vector<2x16x16xf32> to vector<2x16xf32>
    %65 = math.sqrt %64 : vector<2x16xf32>
    %66 = arith.mulf %61, %61 : vector<2x2x16xf32>
    %cst_34 = arith.constant dense<0.000000e+00> : vector<2x2xf32>
    %67 = vector.multi_reduction <add>, %66, %cst_34 [2] : vector<2x2x16xf32> to vector<2x2xf32>
    %68 = math.sqrt %67 : vector<2x2xf32>
    %69 = vector.shape_cast %68 : vector<2x2xf32> to vector<2x2x1xf32>
    %70 = vector.shape_cast %65 : vector<2x16xf32> to vector<2x1x16xf32>
    %71 = vector.broadcast %69 : vector<2x2x1xf32> to vector<2x2x16xf32>
    %72 = vector.broadcast %70 : vector<2x1x16xf32> to vector<2x2x16xf32>
    %73 = arith.mulf %71, %72 : vector<2x2x16xf32>
    %cst_35 = arith.constant 9.99999993E-9 : f32
    %74 = vector.broadcast %cst_35 : f32 to vector<2x2x16xf32>
    %75 = arith.maximumf %73, %74 : vector<2x2x16xf32>
    %76 = tpu.reciprocal %75 {approx = true} : vector<2x2x16xf32> -> vector<2x2x16xf32>
    %77 = arith.mulf %62, %76 : vector<2x2x16xf32>
    %78 = vector.extract_strided_slice %77 {offsets = [0, 0, 0], sizes = [2, 1, 16], strides = [1, 1, 1]} : vector<2x2x16xf32> to vector<2x1x16xf32>
    %79 = vector.shape_cast %78 : vector<2x1x16xf32> to vector<2x16xf32>
    %80 = vector.extract_strided_slice %51 {offsets = [0, 16], sizes = [2, 1], strides = [1, 1]} : vector<2x22xf32> to vector<2x1xf32>
    %81 = vector.extract_strided_slice %51 {offsets = [0, 17], sizes = [2, 1], strides = [1, 1]} : vector<2x22xf32> to vector<2x1xf32>
    %82 = vector.extract_strided_slice %51 {offsets = [0, 18], sizes = [2, 3], strides = [1, 1]} : vector<2x22xf32> to vector<2x3xf32>
    %83 = vector.extract_strided_slice %51 {offsets = [0, 21], sizes = [2, 1], strides = [1, 1]} : vector<2x22xf32> to vector<2x1xf32>
    %c0_36 = arith.constant 0 : index
    %c0_37 = arith.constant 0 : index
    %84 = vector.load %arg16[%c0_36, %c0_37] : memref<2x16xf32, #tpu.memory_space<vmem>>, vector<2x16xf32>
    %cst_38 = arith.constant 0.000000e+00 : f32
    %85 = vector.broadcast %cst_38 : f32 to vector<2x1xf32>
    %86 = arith.maximumf %80, %85 : vector<2x1xf32>
    %87 = math.absf %80 : vector<2x1xf32>
    %cst_39 = arith.constant 0.000000e+00 : f32
    %88 = vector.broadcast %cst_39 : f32 to vector<2x1xf32>
    %89 = arith.subf %88, %87 : vector<2x1xf32>
    %90 = math.exp %89 : vector<2x1xf32>
    %91 = math.log1p %90 : vector<2x1xf32>
    %92 = arith.addf %86, %91 : vector<2x1xf32>
    %cst_40 = arith.constant 5.000000e-01 : f32
    %93 = vector.broadcast %cst_40 : f32 to vector<2x1xf32>
    %94 = arith.mulf %93, %81 : vector<2x1xf32>
    %95 = math.tanh %94 : vector<2x1xf32>
    %cst_41 = arith.constant 1.000000e+00 : f32
    %96 = vector.broadcast %cst_41 : f32 to vector<2x1xf32>
    %97 = arith.addf %95, %96 : vector<2x1xf32>
    %cst_42 = arith.constant 5.000000e-01 : f32
    %98 = vector.broadcast %cst_42 : f32 to vector<2x1xf32>
    %99 = arith.mulf %98, %97 : vector<2x1xf32>
    %cst_43 = arith.constant dense<0xFF800000> : vector<2xf32>
    %100 = vector.multi_reduction <maximumf>, %82, %cst_43 [1] : vector<2x3xf32> to vector<2xf32>
    %101 = vector.shape_cast %100 : vector<2xf32> to vector<2x1xf32>
    %102 = vector.broadcast %101 : vector<2x1xf32> to vector<2x3xf32>
    %103 = arith.subf %82, %102 : vector<2x3xf32>
    %104 = math.exp %103 : vector<2x3xf32>
    %cst_44 = arith.constant dense<0.000000e+00> : vector<2xf32>
    %105 = vector.multi_reduction <add>, %104, %cst_44 [1] : vector<2x3xf32> to vector<2xf32>
    %106 = vector.shape_cast %105 : vector<2xf32> to vector<2x1xf32>
    %107 = tpu.reciprocal %106 {approx = true} : vector<2x1xf32> -> vector<2x1xf32>
    %108 = vector.broadcast %107 : vector<2x1xf32> to vector<2x3xf32>
    %109 = arith.mulf %104, %108 : vector<2x3xf32>
    %cst_45 = arith.constant 0.000000e+00 : f32
    %110 = vector.broadcast %cst_45 : f32 to vector<2x1xf32>
    %111 = arith.maximumf %83, %110 : vector<2x1xf32>
    %112 = math.absf %83 : vector<2x1xf32>
    %cst_46 = arith.constant 0.000000e+00 : f32
    %113 = vector.broadcast %cst_46 : f32 to vector<2x1xf32>
    %114 = arith.subf %113, %112 : vector<2x1xf32>
    %115 = math.exp %114 : vector<2x1xf32>
    %116 = math.log1p %115 : vector<2x1xf32>
    %117 = arith.addf %111, %116 : vector<2x1xf32>
    %cst_47 = arith.constant 1.000000e+00 : f32
    %118 = vector.broadcast %cst_47 : f32 to vector<2x1xf32>
    %119 = arith.addf %118, %117 : vector<2x1xf32>
    %120 = vector.broadcast %92 : vector<2x1xf32> to vector<2x16xf32>
    %121 = arith.mulf %120, %79 : vector<2x16xf32>
    %cst_48 = arith.constant dense<0xFF800000> : vector<2xf32>
    %122 = vector.multi_reduction <maximumf>, %121, %cst_48 [1] : vector<2x16xf32> to vector<2xf32>
    %123 = vector.shape_cast %122 : vector<2xf32> to vector<2x1xf32>
    %124 = vector.broadcast %123 : vector<2x1xf32> to vector<2x16xf32>
    %125 = arith.subf %121, %124 : vector<2x16xf32>
    %126 = math.exp %125 : vector<2x16xf32>
    %cst_49 = arith.constant dense<0.000000e+00> : vector<2xf32>
    %127 = vector.multi_reduction <add>, %126, %cst_49 [1] : vector<2x16xf32> to vector<2xf32>
    %128 = vector.shape_cast %127 : vector<2xf32> to vector<2x1xf32>
    %129 = tpu.reciprocal %128 {approx = true} : vector<2x1xf32> -> vector<2x1xf32>
    %130 = vector.broadcast %129 : vector<2x1xf32> to vector<2x16xf32>
    %131 = arith.mulf %126, %130 : vector<2x16xf32>
    %132 = vector.broadcast %99 : vector<2x1xf32> to vector<2x16xf32>
    %133 = arith.mulf %132, %131 : vector<2x16xf32>
    %cst_50 = arith.constant 1.000000e+00 : f32
    %134 = vector.broadcast %cst_50 : f32 to vector<2x1xf32>
    %135 = arith.subf %134, %99 : vector<2x1xf32>
    %136 = vector.broadcast %135 : vector<2x1xf32> to vector<2x16xf32>
    %137 = arith.mulf %136, %84 : vector<2x16xf32>
    %138 = arith.addf %133, %137 : vector<2x16xf32>
    %139 = vector.extract_strided_slice %138 {offsets = [0, 15], sizes = [2, 1], strides = [1, 1]} : vector<2x16xf32> to vector<2x1xf32>
    %140 = vector.extract_strided_slice %138 {offsets = [0, 0], sizes = [2, 15], strides = [1, 1]} : vector<2x16xf32> to vector<2x15xf32>
    %141 = tpu.concatenate %139, %140 in 1 : vector<2x1xf32>, vector<2x15xf32> -> vector<2x16xf32>
    %142 = vector.extract_strided_slice %138 {offsets = [0, 1], sizes = [2, 15], strides = [1, 1]} : vector<2x16xf32> to vector<2x15xf32>
    %143 = vector.extract_strided_slice %138 {offsets = [0, 0], sizes = [2, 1], strides = [1, 1]} : vector<2x16xf32> to vector<2x1xf32>
    %144 = tpu.concatenate %142, %143 in 1 : vector<2x15xf32>, vector<2x1xf32> -> vector<2x16xf32>
    %145 = vector.extract_strided_slice %109 {offsets = [0, 0], sizes = [2, 1], strides = [1, 1]} : vector<2x3xf32> to vector<2x1xf32>
    %146 = vector.broadcast %145 : vector<2x1xf32> to vector<2x16xf32>
    %147 = arith.mulf %146, %141 : vector<2x16xf32>
    %148 = vector.extract_strided_slice %109 {offsets = [0, 1], sizes = [2, 1], strides = [1, 1]} : vector<2x3xf32> to vector<2x1xf32>
    %149 = vector.broadcast %148 : vector<2x1xf32> to vector<2x16xf32>
    %150 = arith.mulf %149, %138 : vector<2x16xf32>
    %151 = arith.addf %147, %150 : vector<2x16xf32>
    %152 = vector.extract_strided_slice %109 {offsets = [0, 2], sizes = [2, 1], strides = [1, 1]} : vector<2x3xf32> to vector<2x1xf32>
    %153 = vector.broadcast %152 : vector<2x1xf32> to vector<2x16xf32>
    %154 = arith.mulf %153, %144 : vector<2x16xf32>
    %155 = arith.addf %151, %154 : vector<2x16xf32>
    %cst_51 = arith.constant 1.000000e-16 : f32
    %156 = vector.broadcast %cst_51 : f32 to vector<2x16xf32>
    %157 = arith.maximumf %155, %156 : vector<2x16xf32>
    %158 = math.log %157 : vector<2x16xf32>
    %159 = vector.broadcast %119 : vector<2x1xf32> to vector<2x16xf32>
    %160 = arith.mulf %159, %158 : vector<2x16xf32>
    %161 = math.exp %160 : vector<2x16xf32>
    %cst_52 = arith.constant dense<0.000000e+00> : vector<2xf32>
    %162 = vector.multi_reduction <add>, %161, %cst_52 [1] : vector<2x16xf32> to vector<2xf32>
    %163 = vector.shape_cast %162 : vector<2xf32> to vector<2x1xf32>
    %cst_53 = arith.constant 1.000000e-16 : f32
    %164 = vector.broadcast %cst_53 : f32 to vector<2x1xf32>
    %165 = arith.addf %163, %164 : vector<2x1xf32>
    %166 = tpu.reciprocal %165 {approx = true} : vector<2x1xf32> -> vector<2x1xf32>
    %167 = vector.broadcast %166 : vector<2x1xf32> to vector<2x16xf32>
    %168 = arith.mulf %161, %167 : vector<2x16xf32>
    %169 = vector.shape_cast %168 : vector<2x16xf32> to vector<2x16x1xf32>
    %170 = vector.broadcast %169 : vector<2x16x1xf32> to vector<2x16x16xf32>
    %171 = arith.mulf %170, %8 : vector<2x16x16xf32>
    %cst_54 = arith.constant dense<0.000000e+00> : vector<2x16xf32>
    %172 = vector.multi_reduction <add>, %171, %cst_54 [1] : vector<2x16x16xf32> to vector<2x16xf32>
    %173 = vector.extract_strided_slice %77 {offsets = [0, 1, 0], sizes = [2, 1, 16], strides = [1, 1, 1]} : vector<2x2x16xf32> to vector<2x1x16xf32>
    %174 = vector.shape_cast %173 : vector<2x1x16xf32> to vector<2x16xf32>
    %175 = vector.extract_strided_slice %52 {offsets = [0, 16], sizes = [2, 1], strides = [1, 1]} : vector<2x54xf32> to vector<2x1xf32>
    %176 = vector.extract_strided_slice %52 {offsets = [0, 17], sizes = [2, 1], strides = [1, 1]} : vector<2x54xf32> to vector<2x1xf32>
    %177 = vector.extract_strided_slice %52 {offsets = [0, 18], sizes = [2, 3], strides = [1, 1]} : vector<2x54xf32> to vector<2x3xf32>
    %178 = vector.extract_strided_slice %52 {offsets = [0, 21], sizes = [2, 1], strides = [1, 1]} : vector<2x54xf32> to vector<2x1xf32>
    %c0_55 = arith.constant 0 : index
    %c0_56 = arith.constant 0 : index
    %179 = vector.load %arg17[%c0_55, %c0_56] : memref<2x16xf32, #tpu.memory_space<vmem>>, vector<2x16xf32>
    %cst_57 = arith.constant 0.000000e+00 : f32
    %180 = vector.broadcast %cst_57 : f32 to vector<2x1xf32>
    %181 = arith.maximumf %175, %180 : vector<2x1xf32>
    %182 = math.absf %175 : vector<2x1xf32>
    %cst_58 = arith.constant 0.000000e+00 : f32
    %183 = vector.broadcast %cst_58 : f32 to vector<2x1xf32>
    %184 = arith.subf %183, %182 : vector<2x1xf32>
    %185 = math.exp %184 : vector<2x1xf32>
    %186 = math.log1p %185 : vector<2x1xf32>
    %187 = arith.addf %181, %186 : vector<2x1xf32>
    %cst_59 = arith.constant 5.000000e-01 : f32
    %188 = vector.broadcast %cst_59 : f32 to vector<2x1xf32>
    %189 = arith.mulf %188, %176 : vector<2x1xf32>
    %190 = math.tanh %189 : vector<2x1xf32>
    %cst_60 = arith.constant 1.000000e+00 : f32
    %191 = vector.broadcast %cst_60 : f32 to vector<2x1xf32>
    %192 = arith.addf %190, %191 : vector<2x1xf32>
    %cst_61 = arith.constant 5.000000e-01 : f32
    %193 = vector.broadcast %cst_61 : f32 to vector<2x1xf32>
    %194 = arith.mulf %193, %192 : vector<2x1xf32>
    %cst_62 = arith.constant dense<0xFF800000> : vector<2xf32>
    %195 = vector.multi_reduction <maximumf>, %177, %cst_62 [1] : vector<2x3xf32> to vector<2xf32>
    %196 = vector.shape_cast %195 : vector<2xf32> to vector<2x1xf32>
    %197 = vector.broadcast %196 : vector<2x1xf32> to vector<2x3xf32>
    %198 = arith.subf %177, %197 : vector<2x3xf32>
    %199 = math.exp %198 : vector<2x3xf32>
    %cst_63 = arith.constant dense<0.000000e+00> : vector<2xf32>
    %200 = vector.multi_reduction <add>, %199, %cst_63 [1] : vector<2x3xf32> to vector<2xf32>
    %201 = vector.shape_cast %200 : vector<2xf32> to vector<2x1xf32>
    %202 = tpu.reciprocal %201 {approx = true} : vector<2x1xf32> -> vector<2x1xf32>
    %203 = vector.broadcast %202 : vector<2x1xf32> to vector<2x3xf32>
    %204 = arith.mulf %199, %203 : vector<2x3xf32>
    %cst_64 = arith.constant 0.000000e+00 : f32
    %205 = vector.broadcast %cst_64 : f32 to vector<2x1xf32>
    %206 = arith.maximumf %178, %205 : vector<2x1xf32>
    %207 = math.absf %178 : vector<2x1xf32>
    %cst_65 = arith.constant 0.000000e+00 : f32
    %208 = vector.broadcast %cst_65 : f32 to vector<2x1xf32>
    %209 = arith.subf %208, %207 : vector<2x1xf32>
    %210 = math.exp %209 : vector<2x1xf32>
    %211 = math.log1p %210 : vector<2x1xf32>
    %212 = arith.addf %206, %211 : vector<2x1xf32>
    %cst_66 = arith.constant 1.000000e+00 : f32
    %213 = vector.broadcast %cst_66 : f32 to vector<2x1xf32>
    %214 = arith.addf %213, %212 : vector<2x1xf32>
    %215 = vector.broadcast %187 : vector<2x1xf32> to vector<2x16xf32>
    %216 = arith.mulf %215, %174 : vector<2x16xf32>
    %cst_67 = arith.constant dense<0xFF800000> : vector<2xf32>
    %217 = vector.multi_reduction <maximumf>, %216, %cst_67 [1] : vector<2x16xf32> to vector<2xf32>
    %218 = vector.shape_cast %217 : vector<2xf32> to vector<2x1xf32>
    %219 = vector.broadcast %218 : vector<2x1xf32> to vector<2x16xf32>
    %220 = arith.subf %216, %219 : vector<2x16xf32>
    %221 = math.exp %220 : vector<2x16xf32>
    %cst_68 = arith.constant dense<0.000000e+00> : vector<2xf32>
    %222 = vector.multi_reduction <add>, %221, %cst_68 [1] : vector<2x16xf32> to vector<2xf32>
    %223 = vector.shape_cast %222 : vector<2xf32> to vector<2x1xf32>
    %224 = tpu.reciprocal %223 {approx = true} : vector<2x1xf32> -> vector<2x1xf32>
    %225 = vector.broadcast %224 : vector<2x1xf32> to vector<2x16xf32>
    %226 = arith.mulf %221, %225 : vector<2x16xf32>
    %227 = vector.broadcast %194 : vector<2x1xf32> to vector<2x16xf32>
    %228 = arith.mulf %227, %226 : vector<2x16xf32>
    %cst_69 = arith.constant 1.000000e+00 : f32
    %229 = vector.broadcast %cst_69 : f32 to vector<2x1xf32>
    %230 = arith.subf %229, %194 : vector<2x1xf32>
    %231 = vector.broadcast %230 : vector<2x1xf32> to vector<2x16xf32>
    %232 = arith.mulf %231, %179 : vector<2x16xf32>
    %233 = arith.addf %228, %232 : vector<2x16xf32>
    %234 = vector.extract_strided_slice %233 {offsets = [0, 15], sizes = [2, 1], strides = [1, 1]} : vector<2x16xf32> to vector<2x1xf32>
    %235 = vector.extract_strided_slice %233 {offsets = [0, 0], sizes = [2, 15], strides = [1, 1]} : vector<2x16xf32> to vector<2x15xf32>
    %236 = tpu.concatenate %234, %235 in 1 : vector<2x1xf32>, vector<2x15xf32> -> vector<2x16xf32>
    %237 = vector.extract_strided_slice %233 {offsets = [0, 1], sizes = [2, 15], strides = [1, 1]} : vector<2x16xf32> to vector<2x15xf32>
    %238 = vector.extract_strided_slice %233 {offsets = [0, 0], sizes = [2, 1], strides = [1, 1]} : vector<2x16xf32> to vector<2x1xf32>
    %239 = tpu.concatenate %237, %238 in 1 : vector<2x15xf32>, vector<2x1xf32> -> vector<2x16xf32>
    %240 = vector.extract_strided_slice %204 {offsets = [0, 0], sizes = [2, 1], strides = [1, 1]} : vector<2x3xf32> to vector<2x1xf32>
    %241 = vector.broadcast %240 : vector<2x1xf32> to vector<2x16xf32>
    %242 = arith.mulf %241, %236 : vector<2x16xf32>
    %243 = vector.extract_strided_slice %204 {offsets = [0, 1], sizes = [2, 1], strides = [1, 1]} : vector<2x3xf32> to vector<2x1xf32>
    %244 = vector.broadcast %243 : vector<2x1xf32> to vector<2x16xf32>
    %245 = arith.mulf %244, %233 : vector<2x16xf32>
    %246 = arith.addf %242, %245 : vector<2x16xf32>
    %247 = vector.extract_strided_slice %204 {offsets = [0, 2], sizes = [2, 1], strides = [1, 1]} : vector<2x3xf32> to vector<2x1xf32>
    %248 = vector.broadcast %247 : vector<2x1xf32> to vector<2x16xf32>
    %249 = arith.mulf %248, %239 : vector<2x16xf32>
    %250 = arith.addf %246, %249 : vector<2x16xf32>
    %cst_70 = arith.constant 1.000000e-16 : f32
    %251 = vector.broadcast %cst_70 : f32 to vector<2x16xf32>
    %252 = arith.maximumf %250, %251 : vector<2x16xf32>
    %253 = math.log %252 : vector<2x16xf32>
    %254 = vector.broadcast %214 : vector<2x1xf32> to vector<2x16xf32>
    %255 = arith.mulf %254, %253 : vector<2x16xf32>
    %256 = math.exp %255 : vector<2x16xf32>
    %cst_71 = arith.constant dense<0.000000e+00> : vector<2xf32>
    %257 = vector.multi_reduction <add>, %256, %cst_71 [1] : vector<2x16xf32> to vector<2xf32>
    %258 = vector.shape_cast %257 : vector<2xf32> to vector<2x1xf32>
    %cst_72 = arith.constant 1.000000e-16 : f32
    %259 = vector.broadcast %cst_72 : f32 to vector<2x1xf32>
    %260 = arith.addf %258, %259 : vector<2x1xf32>
    %261 = tpu.reciprocal %260 {approx = true} : vector<2x1xf32> -> vector<2x1xf32>
    %262 = vector.broadcast %261 : vector<2x1xf32> to vector<2x16xf32>
    %263 = arith.mulf %256, %262 : vector<2x16xf32>
    %264 = vector.extract_strided_slice %52 {offsets = [0, 22], sizes = [2, 16], strides = [1, 1]} : vector<2x54xf32> to vector<2x16xf32>
    %cst_73 = arith.constant 5.000000e-01 : f32
    %265 = vector.broadcast %cst_73 : f32 to vector<2x16xf32>
    %266 = arith.mulf %265, %264 : vector<2x16xf32>
    %267 = math.tanh %266 : vector<2x16xf32>
    %cst_74 = arith.constant 1.000000e+00 : f32
    %268 = vector.broadcast %cst_74 : f32 to vector<2x16xf32>
    %269 = arith.addf %267, %268 : vector<2x16xf32>
    %cst_75 = arith.constant 5.000000e-01 : f32
    %270 = vector.broadcast %cst_75 : f32 to vector<2x16xf32>
    %271 = arith.mulf %270, %269 : vector<2x16xf32>
    %272 = vector.extract_strided_slice %52 {offsets = [0, 38], sizes = [2, 16], strides = [1, 1]} : vector<2x54xf32> to vector<2x16xf32>
    %273 = vector.shape_cast %263 : vector<2x16xf32> to vector<2x16x1xf32>
    %274 = vector.shape_cast %271 : vector<2x16xf32> to vector<2x1x16xf32>
    %275 = vector.broadcast %273 : vector<2x16x1xf32> to vector<2x16x16xf32>
    %276 = vector.broadcast %274 : vector<2x1x16xf32> to vector<2x16x16xf32>
    %277 = arith.mulf %275, %276 : vector<2x16x16xf32>
    %cst_76 = arith.constant 1.000000e+00 : f32
    %278 = vector.broadcast %cst_76 : f32 to vector<2x16x16xf32>
    %279 = arith.subf %278, %277 : vector<2x16x16xf32>
    %280 = arith.mulf %8, %279 : vector<2x16x16xf32>
    %281 = vector.shape_cast %263 : vector<2x16xf32> to vector<2x16x1xf32>
    %282 = vector.shape_cast %272 : vector<2x16xf32> to vector<2x1x16xf32>
    %283 = vector.broadcast %281 : vector<2x16x1xf32> to vector<2x16x16xf32>
    %284 = vector.broadcast %282 : vector<2x1x16xf32> to vector<2x16x16xf32>
    %285 = arith.mulf %283, %284 : vector<2x16x16xf32>
    %286 = arith.addf %280, %285 : vector<2x16x16xf32>
    %287 = tpu.concatenate %45, %172 in 1 : vector<2x32xf32>, vector<2x16xf32> -> vector<2x48xf32>
    %c0_77 = arith.constant 0 : index
    %c0_78 = arith.constant 0 : index
    %288 = vector.load %arg8[%c0_77, %c0_78] : memref<48x8xf32, #tpu.memory_space<vmem>>, vector<48x8xf32>
    %cst_79 = arith.constant dense<0.000000e+00> : vector<2x8xf32>
    %289 = tpu.matmul %287, %288, %cst_79 {dimension_numbers = #tpu.dot_dimension_numbers<[1], [0], [0], [1], [0, 0, 1, 1], [], []>} : vector<2x48xf32>, vector<48x8xf32>, vector<2x8xf32> -> vector<2x8xf32>
    %c0_80 = arith.constant 0 : index
    %c0_81 = arith.constant 0 : index
    %290 = vector.load %arg9[%c0_80, %c0_81] : memref<1x8xf32, #tpu.memory_space<vmem>>, vector<1x8xf32>
    %291 = vector.broadcast %290 : vector<1x8xf32> to vector<2x8xf32>
    %292 = arith.addf %289, %291 : vector<2x8xf32>
    %cst_82 = arith.constant 5.000000e-01 : f32
    %293 = vector.broadcast %cst_82 : f32 to vector<2x8xf32>
    %294 = arith.mulf %293, %292 : vector<2x8xf32>
    %295 = math.tanh %294 : vector<2x8xf32>
    %cst_83 = arith.constant 1.000000e+00 : f32
    %296 = vector.broadcast %cst_83 : f32 to vector<2x8xf32>
    %297 = arith.addf %295, %296 : vector<2x8xf32>
    %cst_84 = arith.constant 5.000000e-01 : f32
    %298 = vector.broadcast %cst_84 : f32 to vector<2x8xf32>
    %299 = arith.mulf %298, %297 : vector<2x8xf32>
    %c0_85 = arith.constant 0 : index
    %c0_86 = arith.constant 0 : index
    %c0_87 = arith.constant 0 : index
    %300 = vector.load %arg10[%c0_85, %c0_86, %c0_87] : memref<1x2x8xf32, #tpu.memory_space<vmem>>, vector<1x2x8xf32>
    %301 = vector.shape_cast %300 : vector<1x2x8xf32> to vector<2x8xf32>
    %302 = vector.shape_cast %299 : vector<2x8xf32> to vector<1x2x8xf32>
    tpu.vector_store %arg10[%c0_85, %c0_86, %c0_87], %302 {strides = array<i32>} : memref<1x2x8xf32, #tpu.memory_space<vmem>>, vector<1x2x8xf32>,
    %c0_88 = arith.constant 0 : index
    %c0_89 = arith.constant 0 : index
    %303 = vector.load %arg13[%c0_88, %c0_89] : memref<2x16xf32, #tpu.memory_space<vmem>>, vector<2x16xf32>
    tpu.vector_store %arg13[%c0_88, %c0_89], %172 {strides = array<i32>} : memref<2x16xf32, #tpu.memory_space<vmem>>, vector<2x16xf32>,
    %c0_90 = arith.constant 0 : index
    %c0_91 = arith.constant 0 : index
    %304 = vector.load %arg14[%c0_90, %c0_91] : memref<2x32xf32, #tpu.memory_space<vmem>>, vector<2x32xf32>
    tpu.vector_store %arg14[%c0_90, %c0_91], %45 {strides = array<i32>} : memref<2x32xf32, #tpu.memory_space<vmem>>, vector<2x32xf32>,
    %c0_92 = arith.constant 0 : index
    %c0_93 = arith.constant 0 : index
    %305 = vector.load %arg15[%c0_92, %c0_93] : memref<2x32xf32, #tpu.memory_space<vmem>>, vector<2x32xf32>
    tpu.vector_store %arg15[%c0_92, %c0_93], %43 {strides = array<i32>} : memref<2x32xf32, #tpu.memory_space<vmem>>, vector<2x32xf32>,
    %c0_94 = arith.constant 0 : index
    %c0_95 = arith.constant 0 : index
    %306 = vector.load %arg16[%c0_94, %c0_95] : memref<2x16xf32, #tpu.memory_space<vmem>>, vector<2x16xf32>
    tpu.vector_store %arg16[%c0_94, %c0_95], %168 {strides = array<i32>} : memref<2x16xf32, #tpu.memory_space<vmem>>, vector<2x16xf32>,
    %c0_96 = arith.constant 0 : index
    %c0_97 = arith.constant 0 : index
    %307 = vector.load %arg17[%c0_96, %c0_97] : memref<2x16xf32, #tpu.memory_space<vmem>>, vector<2x16xf32>
    tpu.vector_store %arg17[%c0_96, %c0_97], %263 {strides = array<i32>} : memref<2x16xf32, #tpu.memory_space<vmem>>, vector<2x16xf32>,
    %c0_98 = arith.constant 0 : index
    %c0_99 = arith.constant 0 : index
    %c0_100 = arith.constant 0 : index
    %308 = vector.load %arg18[%c0_98, %c0_99, %c0_100] : memref<2x16x16xf32, #tpu.memory_space<vmem>>, vector<2x16x16xf32>
    tpu.vector_store %arg18[%c0_98, %c0_99, %c0_100], %286 {strides = array<i32>} : memref<2x16x16xf32, #tpu.memory_space<vmem>>, vector<2x16x16xf32>,
    %c7_i32 = arith.constant 7 : i32
    %309 = arith.cmpi eq, %arg0, %c7_i32 : i32
    %310 = arith.extui %309 : i1 to i32
    %c0_i32_101 = arith.constant 0 : i32
    %311 = arith.cmpi ne, %310, %c0_i32_101 : i32
    scf.if %311 {
      %312 = tpu.concatenate %172, %45, %43, %168, %263 in 1 : vector<2x16xf32>, vector<2x32xf32>, vector<2x32xf32>, vector<2x16xf32>, vector<2x16xf32> -> vector<2x112xf32>
      %c0_102 = arith.constant 0 : index
      %c0_103 = arith.constant 0 : index
      %313 = vector.load %arg11[%c0_102, %c0_103] : memref<2x112xf32, #tpu.memory_space<vmem>>, vector<2x112xf32>
      tpu.vector_store %arg11[%c0_102, %c0_103], %312 {strides = array<i32>} : memref<2x112xf32, #tpu.memory_space<vmem>>, vector<2x112xf32>,
      %c0_104 = arith.constant 0 : index
      %c0_105 = arith.constant 0 : index
      %c0_106 = arith.constant 0 : index
      %314 = vector.load %arg12[%c0_104, %c0_105, %c0_106] : memref<2x16x16xf32, #tpu.memory_space<vmem>>, vector<2x16x16xf32>
      tpu.vector_store %arg12[%c0_104, %c0_105, %c0_106], %286 {strides = array<i32>} : memref<2x16x16xf32, #tpu.memory_space<vmem>>, vector<2x16x16xf32>,
    } else {
    }
    return
  }
  func.func @transform_0(%arg0: i32) -> (i32, i32, i32) {
    %c0_i32 = arith.constant 0 : i32
    %c0_i32_0 = arith.constant 0 : i32
    %c0_i32_1 = arith.constant 0 : i32
    return %arg0, %c0_i32, %c0_i32_0 : i32, i32, i32
  }
  func.func @transform_1(%arg0: i32) -> (i32, i32) {
    %c0_i32 = arith.constant 0 : i32
    %c0_i32_0 = arith.constant 0 : i32
    %c0_i32_1 = arith.constant 0 : i32
    return %c0_i32, %c0_i32_0 : i32, i32
  }
  func.func @transform_2(%arg0: i32) -> (i32, i32, i32) {
    %c0_i32 = arith.constant 0 : i32
    %c0_i32_0 = arith.constant 0 : i32
    %c0_i32_1 = arith.constant 0 : i32
    %c0_i32_2 = arith.constant 0 : i32
    return %c0_i32, %c0_i32_0, %c0_i32_1 : i32, i32, i32
  }
  func.func @transform_3(%arg0: i32) -> (i32, i32) {
    %c0_i32 = arith.constant 0 : i32
    %c0_i32_0 = arith.constant 0 : i32
    %c0_i32_1 = arith.constant 0 : i32
    return %c0_i32, %c0_i32_0 : i32, i32
  }
  func.func @transform_4(%arg0: i32) -> (i32, i32) {
    %c0_i32 = arith.constant 0 : i32
    %c0_i32_0 = arith.constant 0 : i32
    %c0_i32_1 = arith.constant 0 : i32
    return %c0_i32, %c0_i32_0 : i32, i32
  }
  func.func @transform_5(%arg0: i32) -> (i32, i32) {
    %c0_i32 = arith.constant 0 : i32
    %c0_i32_0 = arith.constant 0 : i32
    %c0_i32_1 = arith.constant 0 : i32
    return %c0_i32, %c0_i32_0 : i32, i32
  }
  func.func @transform_6(%arg0: i32) -> (i32, i32) {
    %c0_i32 = arith.constant 0 : i32
    %c0_i32_0 = arith.constant 0 : i32
    %c0_i32_1 = arith.constant 0 : i32
    return %c0_i32, %c0_i32_0 : i32, i32
  }
  func.func @transform_7(%arg0: i32) -> (i32, i32) {
    %c0_i32 = arith.constant 0 : i32
    %c0_i32_0 = arith.constant 0 : i32
    %c0_i32_1 = arith.constant 0 : i32
    return %c0_i32, %c0_i32_0 : i32, i32
  }
  func.func @transform_8(%arg0: i32) -> (i32, i32) {
    %c0_i32 = arith.constant 0 : i32
    %c0_i32_0 = arith.constant 0 : i32
    %c0_i32_1 = arith.constant 0 : i32
    return %c0_i32, %c0_i32_0 : i32, i32
  }
  func.func @transform_9(%arg0: i32) -> (i32, i32, i32) {
    %c0_i32 = arith.constant 0 : i32
    %c0_i32_0 = arith.constant 0 : i32
    %c0_i32_1 = arith.constant 0 : i32
    return %arg0, %c0_i32, %c0_i32_0 : i32, i32, i32
  }
  func.func @transform_10(%arg0: i32) -> (i32, i32) {
    %c0_i32 = arith.constant 0 : i32
    %c0_i32_0 = arith.constant 0 : i32
    %c0_i32_1 = arith.constant 0 : i32
    return %c0_i32, %c0_i32_0 : i32, i32
  }
  func.func @transform_11(%arg0: i32) -> (i32, i32, i32) {
    %c0_i32 = arith.constant 0 : i32
    %c0_i32_0 = arith.constant 0 : i32
    %c0_i32_1 = arith.constant 0 : i32
    %c0_i32_2 = arith.constant 0 : i32
    return %c0_i32, %c0_i32_0, %c0_i32_1 : i32, i32, i32
  }
}

</mosaic_0001>

<bundles_post_ra>
// kernel: ntm_forward_seq.1
= control target key start
LH: loop header
LB: loop body
LE: loop exit
PB: predicated region body
PF: predicated region fallthrough
CT: control target
= control target key end

     0   :  { %s2441_s0 = inlined_call_operand.vmem [shape: f32[8,2,8], index: 0, kind: input, shape index: {}]   ;;  %s2442_s1 = inlined_call_operand.vmem [shape: f32[2,112], index: 1, kind: input, shape index: {}]   ;;  %s2443_s2 = inlined_call_operand.vmem [shape: f32[2,16,16], index: 2, kind: input, shape index: {}]   ;;  %s2444_s3 = inlined_call_operand.vmem [shape: f32[56,128], index: 3, kind: input, shape index: {}]   ;;  %s2445_s4 = inlined_call_operand.vmem [shape: f32[1,128], index: 4, kind: input, shape index: {}]   ;;  %s2446_s5 = inlined_call_operand.vmem [shape: f32[32,76], index: 5, kind: input, shape index: {}]   ;;  %s2447_s6 = inlined_call_operand.vmem [shape: f32[1,76], index: 6, kind: input, shape index: {}]   ;;  %s2448_s7 = inlined_call_operand.vmem [shape: f32[48,8], index: 7, kind: input, shape index: {}]   ;;  %s2449_s8 = inlined_call_operand.vmem [shape: f32[1,8], index: 8, kind: input, shape index: {}]   ;;  %s2450_s9 = inlined_call_operand.hbm [shape: f32[8,2,8], index: 9, kind: output, shape index: {0}]   ;;  %s2451_s10 = inlined_call_operand.vmem [shape: f32[2,112], index: 10, kind: output, shape index: {1}]   ;;  %s2452_s11 = inlined_call_operand.hbm [shape: f32[2,16,16], index: 11, kind: output, shape index: {2}]  }
   0x1   :  { %2457 = sst [smem:[#allocation16_spill]] %s2441_s0 }
   0x2   :  { %17 = vsyncpa [#allocation9], 0 }
   0x3   :  { %19 = vsyncpa [#allocation9 + $0x1], 0 }
   0x4   :  { %20 = vsyncpa [#allocation11], 0  ;;  %s2022_s17 = smov 0   ;;  %s2024_s18 = smov 0  }
   0x5   :  { %s2026_s19 = smov 0   ;;  %s2028_s20 = smov 0  }
   0x6 LB: > { %2458 = sst [smem:[#allocation14_spill]] %s1916_s19  ;;  %s2043_s21 = sadd.s32 4294967295, %s1920_s20   ;;  %s1920_s20 = sphi %s2028_s20, %s2476_s20   ;;  %s1916_s19 = sphi %s2026_s19, %s2473_s19   ;;  %s1912_s18 = sphi %s2024_s18, %s2475_s18   ;;  %s1908_s17 = sphi %s2022_s17, %s2474_s17  }
   0x7   : > { %s1567_s22 = sadd.s32 4294967294, %s1920_s20   ;;  %s2047_s23 = sadd.s32 1, %s1920_s20  }
   0x8   : > { %s227_s24 = sadd.s32 1, %s1916_s19  ;;  %s224_s25 = ssub.s32 %s1920_s20, %s2047_s23 }
   0x9   : > { %p237_p0 = scmp.ne.s32.totalorder %s1916_s19, %s1912_s18  ;;  %p225_p1 = scmp.eq.s32.totalorder %s224_s25, 0 }
   0xa   : > { %p2456_p2 = scmp.eq.s32.totalorder %s2043_s21, 7  ;;  %p243_p3 = scmp.ne.s32.totalorder %s1912_s18, %s1908_s17 }
   0xb   : > { %p244_p4 = scmp.eq.s32.totalorder %s1567_s22, 7  ;;  %p1570_p7 = scmp.ge.s32.totalorder %s1920_s20, 1 }
   0xc   : > { %s2058_s26 = scalar_select %p225_p1, %s1916_s19, %s227_s24  }
   0xd   : > { %p2062_p5 = por %p2456_p2, %p237_p0  ;;  %p2066_p6 = por %p244_p4, %p243_p3 }
   0xe   : > { %2459 = sst [smem:[#allocation15_spill]] %s2058_s26  ;;  %p335_p8 = scmp.lt.s32.totalorder %s1920_s20, 9 }
   0xf   : > { %s2461_s28 = scalar_select %p2066_p6, 1, 0 }
  0x10   : > { %p336_p9 = pnand %p1570_p7, %p335_p8 }
  0x11   : > { %s2453_s29 = sand.u32 (!%p336_p9), 1, %s1912_s18   ;;  %p374_p10 = scmp.lt.s32.totalorder (!%p336_p9), %s2043_s21, 7 }
  0x12   : > { %339 = sbr.rel (%p336_p9) target bundleno = 2905 (0xb59), region = 56  ;;  %s2076_s30 = sshll.u32 (!%p336_p9), %s2453_s29, 1 }
  0x13   : > { %s2462_s0 = sld [smem:[#allocation16_spill]] (!%p336_p9)  ;;  %p1573_p11 = scmp.ne.s32.totalorder (!%p336_p9), %s2043_s21, 0 }
  0x17   : > { %s375_s12 = scalar_select %p374_p10, %s2043_s21, 7 }
  0x18   : > { %381 = sbr.rel (%p1573_p11) target bundleno = 151 (0x97), region = 60  ;;  %s1922_s26 = smov (!%p1573_p11), 48  }
  0x19   : > { %s1572_s13 = sshll.u32 %s375_s12, 1  ;;  %s1923_s29 = smov (!%p1573_p11), 112  }
  0x1a   : > { %s2082_s16 = scalar_lea.vmem %s2462_s0, %s1572_s13  ;;  %s1925_s19 = smov (!%p1573_p11), 80  }
  0x1d   : > { %v382_v0 = vld [vmem:[%s2442_s1] sm:$0x3]  ;;  %vm383_vm0 = vcmask 123904   ;;  %v404_v2 = vld [vmem:[%s2443_s2 + $0x8] sm:$0xff]  ;;  %vm407_vm1 = vcmask 130048   ;;  %v405_v3 = vld [vmem:[%s2443_s2 + $0x10] sm:$0xff] }
  0x1e   : > { %395 = vrot.lane.b32.xlu1 %v382_v0, %s1922_s26  ;;  %386 = vrot.lane.b32.xlu0 %v382_v0, %s1923_s29  ;;  %384 = vst.msk [vmem:[#allocation2] sm:$0x3] %vm383_vm0, %v382_v0  ;;  %v403_v1 = vld [vmem:[%s2443_s2] sm:$0xff]  ;;  %v406_v4 = vld [vmem:[%s2443_s2 + $0x18] sm:$0xff]  ;;  %s1924_s26 = smov 32   ;;  %vm389_vm2 = vcmask 254976  }
  0x1f   : > { %408 = vst.msk [vmem:[#allocation7] sm:$0xff] %vm407_vm1, %v403_v1  ;;  %409 = vst.msk [vmem:[#allocation7 + $0x8] sm:$0xff] %vm407_vm1, %v404_v2 }
  0x20   : > { %410 = vst.msk [vmem:[#allocation7 + $0x10] sm:$0xff] %vm407_vm1, %v405_v3  ;;  %411 = vst.msk [vmem:[#allocation7 + $0x18] sm:$0xff] %vm407_vm1, %v406_v4 }
  0x22   : > { %399 = vrot.lane.b32.xlu1 %v382_v0, %s1924_s26  ;;  %391 = vrot.lane.b32.xlu0 %v382_v0, %s1925_s19 }
  0x90   : > { %v396_v5 = vpop.permute.xlu1 %395  ;;  %v387_v6 = vpop.permute.xlu0 %386 }
  0x91   : > { %398 = vst.msk [vmem:[#allocation5] sm:$0x3] %vm383_vm0, %v396_v5 }
  0x92   : > { %390 = vst.msk [vmem:[#allocation3] sm:$0x3] %vm389_vm2, %v387_v6 }
  0x94   : > { %v400_v7 = vpop.permute.xlu1 %399  ;;  %v392_v8 = vpop.permute.xlu0 %391 }
  0x95   : > { %402 = vst.msk [vmem:[#allocation6] sm:$0x3] %vm383_vm0, %v400_v7 }
  0x96   : > { %394 = vst.msk [vmem:[#allocation4] sm:$0x3] %vm389_vm2, %v392_v8 }
  0x97 PF: > { %v413_v9 = vld [vmem:[#allocation2] sm:$0x3]  ;;  %s2455_s29 = smov 8   ;;  %v438_v10 = vld [vmem:[%s2444_s3 + $0x30] sm:$0xff]  ;;  %v1927_v12 = vmov 0.0   ;;  %v437_v13 = vld [vmem:[%s2444_s3 + $0x28] sm:$0xff]  ;;  %v641_v56 = vlaneseq }
  0x98   : > { %421 = vrot.lane.b32.xlu0 %v413_v9, %s2455_s29  ;;  %1619 = vmatprep.subr.mxu0 %v1927_v12  ;;  %vm1928_vm3 = vmmov 0   ;;  %v436_v14 = vld [vmem:[%s2444_s3 + $0x20] sm:$0xff]  ;;  %s1929_s25 = smov 24   ;;  %v435_v15 = vld [vmem:[%s2444_s3 + $0x18] sm:$0xff]  ;;  %v434_v16 = vld [vmem:[%s2444_s3 + $0x10] sm:$0xff]  ;;  %vm428_vm4 = vcmask 64512  }
  0x99   : > { %v414_v11 = vld [vmem:[#allocation3] sm:$0x3]  ;;  %1636 = vmatprep.subr.mxu1 %v1927_v12  ;;  %1620 = vmatpush3.msra.mxu0 %v438_v10  ;;  %v433_v17 = vld [vmem:[%s2444_s3 + $0x8] sm:$0xff]  ;;  %v412_v20 = vld [vmem:[%s2082_s16] sm:$0x3]  ;;  %vm430_vm5 = vcmask 195584  }
  0x9a   : > { %1633 = vmatprep.mubr.msk.f32.mxu0 %vm1928_vm3, %v1927_v12  ;;  %1621 = vmatprep.subr.mxu0 %v1927_v12  ;;  %v432_v18 = vld [vmem:[%s2444_s3] sm:$0xff]  ;;  %vm446_vm6 = vcmask 457728   ;;  %s1930_s19 = smov 64   ;;  %s1931_s16 = smov 32   ;;  %v549_v40 = vld [vmem:[%s2446_s5 + $0x18] sm:$0xff]  ;;  %v548_v41 = vld [vmem:[%s2446_s5 + $0x10] sm:$0xff] }
  0x9b   : > { %1644 = vmatprep.mubr.msk.f32.mxu1 %vm1928_vm3, %v1927_v12  ;;  %1622 = vmatpush3.msra.mxu0 %v437_v13  ;;  %v1574_v24 = vld [vmem:[%s2445_s4] ss:$0 sm:$0xff]  ;;  %v547_v42 = vld [vmem:[%s2446_s5 + $0x8] sm:$0xff]  ;;  %vm1421_vm7 = vcmask 254976   ;;  %vm560_vm8 = vcmask 261120   ;;  %v2180_v48 = vld [vmem:[#allocation7 + $0x8] sm:$0xff] }
  0x9c   : > { %425 = vrot.lane.b32.xlu0 %v414_v11, %s1929_s25  ;;  %1623 = vmatprep.subr.mxu0 %v1927_v12  ;;  %v546_v43 = vld [vmem:[%s2446_s5] sm:$0xff]  ;;  %vm681_vm9 = vcmask 130048   ;;  %v634_v50 = vadd.f32 1e-16, %v2180_v48  ;;  %v1932_v54 = vmov 1966171168  }
  0x9d   : > { %1624 = vmatpush3.msra.mxu0 %v436_v14  ;;  %v415_v29 = vld [vmem:[#allocation4] sm:$0x3]  ;;  %1637 = vmatpush3.msra.mxu1 %v549_v40  ;;  %v2186_v52 = vld [vmem:[#allocation7 + $0x10] sm:$0xff]  ;;  %v639_v55 = vunpack.c.l.s4 %v1932_v54  ;;  %v2194_v57 = vld [vmem:[#allocation7] sm:$0xff]  ;;  %v2198_v60 = vshrl.u32 %v641_v56, 7  ;;  %v1933_v8 = vmov 16  }
  0x9e   : > { %1625 = vmatprep.subr.mxu0 %v1927_v12  ;;  %1638 = vmatprep.subr.mxu1 %v1927_v12  ;;  %v2182_v49 = vld [vmem:[#allocation7 + $0x18] sm:$0xff]  ;;  %v635_v53 = vadd.f32 1e-16, %v2186_v52  ;;  %v633_v58 = vadd.f32 1e-16, %v2194_v57  ;;  %s1934_s12 = smov 106  }
  0x9f   : > { %1626 = vmatpush3.msra.mxu0 %v435_v15  ;;  %1639 = vmatpush3.msra.mxu1 %v548_v41  ;;  %v636_v51 = vadd.f32 1e-16, %v2182_v49  ;;  %v640_v59 = vunpack.c.0.s8 %v639_v55  ;;  %v1576_v61 = vld [vmem:[%s2447_s6] ss:$0 sm:$0xff]  ;;  %v2213_v3 = vsub.s32 0, %v2198_v60  ;;  %vm676_vm10 = vcmask 1040384  }
  0xa0   : > { %1627 = vmatprep.subr.mxu0 %v1927_v12  ;;  %1640 = vmatprep.subr.mxu1 %v1927_v12  ;;  %v840_v13 = vmul.f32 %v633_v58, %v633_v58  ;;  %v842_v14 = vmul.f32 %v635_v53, %v635_v53  ;;  %vm886_vm11 = vcmask 123904   ;;  %vm964_vm12 = vcmask 165008   ;;  %s1935_s13 = smov 110   ;;  %s1942_s14 = smov 1  }
  0xa1   : > { %1628 = vmatpush3.msra.mxu0 %v434_v16  ;;  %1641 = vmatpush3.msra.mxu1 %v547_v42  ;;  %v2206_v62 = vsub.s32 %v640_v59, %v2198_v60  ;;  %v843_v10 = vmul.f32 %v636_v51, %v636_v51  ;;  %s1943_s15 = smov 113   ;;  %s1944_s24 = smov 15  }
  0xa2   : > { %1629 = vmatprep.subr.mxu0 %v1927_v12  ;;  %1642 = vmatprep.subr.mxu1 %v1927_v12  ;;  %v844_v15 = vsel %vm681_vm9, %v840_v13, 0.0  ;;  %v850_v16 = vsel %vm681_vm9, %v842_v14, 0.0  ;;  %s1945_s25 = smov 127   ;;  %s1946_s26 = smov 88  }
  0xa3   : > { %1630 = vmatpush3.msra.mxu0 %v433_v17  ;;  %1643 = vmatpush3.msra.mxu1 %v546_v43  ;;  %v853_v11 = vsel %vm681_vm9, %v843_v10, 0.0  ;;  %v841_v17 = vmul.f32 %v634_v50, %v634_v50  ;;  %p1586_p12 = scmp.ne.s32.totalorder %s2043_s21, 7 }
  0xa4   : > { %1631 = vmatprep.subr.mxu0 %v1927_v12  ;;  %1647 = vmatprep.subr.mxu1 %v1927_v12  ;;  %s1957_s22 = smov (!%p1586_p12), 16  }
  0xa5   : > { %1632 = vmatpush3.msra.mxu0 %v432_v18  ;;  %1760 = vset.pattern.permute.xlu0 %v1933_v8  ;;  %v847_v18 = vsel %vm681_vm9, %v841_v17, 0.0 }
  0xa6   : > { %1654 = vmatprep.subr.mxu0 %v1927_v12 }
 0x10a   : > { %v422_v19 = vpop.permute.xlu0 %421 }
 0x10b   : > { %v429_v21 = vsel %vm428_vm4, %v412_v20, %v422_v19 }
 0x10e   : > { %v426_v22 = vpop.permute.xlu0 %425 }
 0x10f   : > { %v431_v23 = vsel %vm430_vm5, %v429_v21, %v426_v22 }
 0x110   : > { %1634 = vmatmul.mubr.msk.f32.vlgmr.msra.gmra.mxu0 %vm446_vm6, %v431_v23 }
 0x111   : > { %1658 = vmatprep.mubr.msk.f32.mxu0 %vm1928_vm3, %v1927_v12  ;;  %1655 = vmatpush3.xpose.msk.msra.mxu0 %vm681_vm9, %v636_v51 }
 0x112   : > { %1656 = vmatprep.subr.mxu0 %v1927_v12 }
 0x115   : > { %1657 = vmatpush3.xpose.msk.msra.mxu0 %vm681_vm9, %v635_v53 }
 0x1d0   : > { %v516_v25 = vpop.f32.mrf.mxu0 }
 0x1d1   : > { %v517_v26 = vadd.f32 %v1574_v24, %v516_v25 }
 0x1d2   : > { %v1635_v27 = vpop.f32.mrf.mxu0 }
 0x1d3   : > { %1774 = vtanh.f32 %v517_v26  ;;  %v520_v30 = vmul.f32 0.5, %v517_v26 }
 0x1d5   : > { %1776 = vtanh.f32 %v520_v30 }
 0x1e0   : > { %v1775_v28 = vpop.eup %1774 }
 0x1e1   : > { %531 = vrot.lane.b32.xlu1 %v1775_v28, %s1930_s19 }
 0x1e2   : > { %v1777_v31 = vpop.eup %1776 }
 0x1e3   : > { %v522_v32 = vadd.f32 1.0, %v1777_v31 }
 0x1e5   : > { %526 = vrot.lane.b32.xlu1 %v415_v29, %s1931_s16  ;;  %v523_v33 = vmul.f32 0.5, %v522_v32 }
 0x253   : > { %v532_v34 = vpop.permute.xlu1 %531 }
 0x254   : > { %v534_v35 = vmul.f32 %v532_v34, %v523_v33 }
 0x256   : > { %536 = vrot.lane.b32.xlu0 %v534_v35, %s1931_s16 }
 0x257   : > { %v527_v36 = vpop.permute.xlu1 %526 }
 0x258   : > { %v529_v37 = vmul.f32 %v527_v36, %v523_v33 }
 0x2c8   : > { %v537_v38 = vpop.permute.xlu0 %536 }
 0x2c9   : > { %v2148_v39 = vadd.f32 %v537_v38, %v529_v37 }
 0x2cb   : > { %1778 = vtanh.f32 %v2148_v39 }
 0x2d8   : > { %v1779_v44 = vpop.eup %1778 }
 0x2d9   : > { %542 = vrot.lane.b32.xlu1 %v1779_v44, %s1930_s19  ;;  %s1956_s19 = smov (!%p1586_p12), 80  }
 0x34b   : > { %v543_v45 = vpop.permute.xlu1 %542 }
 0x34c   : > { %v2168_v46 = vmul.f32 %v543_v45, %v523_v33 }
 0x34e   : > { %558 = vrot.lane.b32.xlu0 %v2168_v46, %s1931_s16 }
 0x3c0   : > { %v2172_v47 = vpop.permute.xlu0 %558 }
 0x3c1   : > { %1422 = vst.msk [vmem:[#allocation3] sm:$0x3] %vm1421_vm7, %v2172_v47  ;;  %1645 = vmatmul.mubr.msk.f32.vlgmr.msra.gmra.mxu1 %vm560_vm8, %v2172_v47 }
 0x3c2   : > { %1651 = vmatprep.mubr.msk.f32.mxu1 %vm1928_vm3, %v1927_v12  ;;  %1648 = vmatpush3.xpose.msk.msra.mxu1 %vm681_vm9, %v634_v50 }
 0x3c3   : > { %1649 = vmatprep.subr.mxu1 %v1927_v12 }
 0x3c6   : > { %1650 = vmatpush3.xpose.msk.msra.mxu1 %vm681_vm9, %v633_v58 }
 0x3c7   : > { %1661 = vmatprep.subr.mxu1 %v1927_v12 }
 0x481   : > { %v629_v63 = vpop.f32.mrf.mxu1 }
 0x482   : > { %v2208_v0 = vadd.f32 %v1576_v61, %v629_v63  ;;  %v912_v61 = vand.u32 127, %v641_v56 }
 0x483   : > { %v1646_v1 = vpop.f32.mrf.mxu1 }
 0x484   : > { %v644_v2 = vrot.slane %v2208_v0, %v2206_v62  ;;  %v946_v19 = vand.u32 2147483647, %v2208_v0  ;;  %v965_v34 = vsel %vm964_vm12, %v2208_v0, -inf  ;;  %v945_v43 = vmax.f32 %v2208_v0, 0.0 }
 0x485   : > { %vm922_vm12 = vcmask 130112  }
 0x486   : > { %v652_v4 = vrot.slane %v644_v2, %v2206_v62  ;;  %v645_v5 = vcombine.high %v644_v2, %v644_v2  ;;  %v947_v20 = vsub.f32 0.0, %v946_v19 }
 0x488   : > { %v2217_v6 = vrot.slane %v652_v4, %v2213_v3  ;;  %v659_v7 = vrot.slane %v645_v5, %v2206_v62  ;;  %v948_v21 = vmul.f32 1.442695, %v947_v20  ;;  %v917_v5 = vadd.s32 4294967288, %v912_v61 }
 0x48a   : > { %670 = vrot.lane.b32.xlu0 %v2217_v6, %s1934_s12  ;;  %v2222_v9 = vrot.slane %v659_v7, %v2213_v3  ;;  %1780 = vpow2.f32 %v948_v21 }
 0x48c   : > { %672 = vrot.lane.b32.xlu1 %v2222_v9, %s1934_s12  ;;  %s1958_s12 = smov (!%p1586_p12), 96  }
 0x497   : > { %v1781_v22 = vpop.eup %1780 }
 0x498   : > { %v950_v27 = vadd.f32 1.0, %v1781_v22  ;;  %v953_v35 = vmul.f32 -0.5, %v1781_v22  ;;  %v956_v38 = vand.u32 2147483647, %v1781_v22 }
 0x49a   : > { %1782 = vlog2.f32 %v950_v27  ;;  %v954_v37 = vadd.f32 1.0, %v953_v35  ;;  %vm957_vm13 = vcmp.lt.f32.partialorder %v956_v38, 0.0004427343 }
 0x49c   : > { %v955_v41 = vmul.f32 %v1781_v22, %v954_v37  ;;  %v915_v22 = vsub.s32 %v912_v61, %v2198_v60 }
 0x4a7   : > { %v1783_v36 = vpop.eup %1782 }
 0x4a8   : > { %v952_v40 = vmul.f32 0.6931472, %v1783_v36 }
 0x4a9   : > { %854 = vadd.xlane.f32.xlu0 %v853_v11 }
 0x4aa   : > { %v958_v42 = vsel %vm957_vm13, %v955_v41, %v952_v40 }
 0x4ab   : > { %v2238_v44 = vadd.f32 %v958_v42, %v945_v43 }
 0x4ad   : > { %845 = vadd.xlane.f32.xlu0 %v844_v15 }
 0x4b0   : > { %851 = vadd.xlane.f32.xlu1 %v850_v16 }
 0x4b4   : > { %848 = vadd.xlane.f32.xlu1 %v847_v18 }
 0x4fc   : > { %v671_v23 = vpop.permute.xlu0 %670 }
 0x4fd   : > { %v677_v24 = vsel %vm676_vm10, %v652_v4, %v671_v23 }
 0x4fe   : > { %v679_v25 = vadd.f32 1e-16, %v677_v24  ;;  %v673_v26 = vpop.permute.xlu1 %672  ;;  %v920_v24 = vsub.s32 %v917_v5, %v2198_v60 }
 0x4ff   : > { %v678_v28 = vsel %vm676_vm10, %v659_v7, %v673_v26 }
 0x500   : > { %v680_v29 = vadd.f32 1e-16, %v678_v28  ;;  %1652 = vmatmul.mubr.msk.f32.vlgmr.msra.gmra.mxu1 %vm681_vm9, %v679_v25  ;;  %v884_v30 = vmul.f32 %v679_v25, %v679_v25 }
 0x501   : > { %1673 = vmatprep.mubr.msk.f32.mxu1 %vm1928_vm3, %v1927_v12 }
 0x502   : > { %1659 = vmatmul.mubr.msk.f32.vlgmr.msra.gmra.mxu0 %vm681_vm9, %v680_v29  ;;  %v887_v31 = vsel %vm886_vm11, %v884_v30, 0.0  ;;  %v885_v32 = vmul.f32 %v680_v29, %v680_v29 }
 0x503   : > { %888 = vadd.xlane.f32.xlu1 %v887_v31 }
 0x504   : > { %v890_v33 = vsel %vm886_vm11, %v885_v32, 0.0 }
 0x505   : > { %891 = vadd.xlane.f32.xlu0 %v890_v33 }
 0x507   : > { %966 = vmax.xlane.f32.xlu1 %v965_v34 }
 0x51b   : > { %984 = vperm.xlu0 %1760, %v2238_v44  }
 0x532   : > { %v855_v45 = vpop.xlane.xlu0 %854 }
 0x533   : > { %vm879_vm0 = vcmp.eq.f32.partialorder %v855_v45, inf  ;;  %vm881_vm4 = vcmp.eq.f32.partialorder %v855_v45, 0.0  ;;  %v882_v17 = vand.u32 2147483648, %v855_v45 }
 0x536   : > { %v846_v51 = vpop.xlane.xlu0 %845 }
 0x537   : > { %1784 = vrsqrt.f32 %v846_v51  ;;  %vm858_vm15 = vcmp.eq.f32.partialorder %v846_v51, inf  ;;  %vm860_vm1 = vcmp.eq.f32.partialorder %v846_v51, 0.0  ;;  %v861_v10 = vand.u32 2147483648, %v846_v51 }
 0x539   : > { %v852_v50 = vpop.xlane.xlu1 %851 }
 0x53a   : > { %vm872_vm3 = vcmp.eq.f32.partialorder %v852_v50, inf  ;;  %v875_v56 = vand.u32 2147483648, %v852_v50  ;;  %vm874_vm5 = vcmp.eq.f32.partialorder %v852_v50, 0.0 }
 0x53d   : > { %v849_v53 = vpop.xlane.xlu1 %848 }
 0x53e   : > { %1786 = vrsqrt.f32 %v849_v53  ;;  %vm865_vm14 = vcmp.eq.f32.partialorder %v849_v53, inf  ;;  %v868_v8 = vand.u32 2147483648, %v849_v53  ;;  %vm867_vm2 = vcmp.eq.f32.partialorder %v849_v53, 0.0 }
 0x53f   : > { %1788 = vrsqrt.f32 %v855_v45 }
 0x540   : > { %1790 = vrsqrt.f32 %v852_v50 }
 0x544   : > { %v1785_v58 = vpop.eup %1784 }
 0x545   : > { %v857_v2 = vmul.f32 %v1785_v58, %v846_v51 }
 0x547   : > { %v859_v15 = vsel %vm858_vm15, %v846_v51, %v857_v2  ;;  %vm933_vm15 = vcmask 1041409  }
 0x548   : > { %v862_v20 = vsel %vm860_vm1, %v861_v10, %v859_v15  ;;  %v1936_v15 = vmov 17   ;;  %vm1115_vm1 = vcmask 345408  }
 0x549   : > { %v916_v28 = vrot.slane %v862_v20, %v915_v22  ;;  %1761 = vset.pattern.permute.xlu1 %v1936_v15  ;;  %1762 = vset.pattern.permute.xlu0 %v1936_v15 }
 0x54b   : > { %v1787_v59 = vpop.eup %1786 }
 0x54c   : > { %v1789_v63 = vpop.eup %1788  ;;  %v864_v1 = vmul.f32 %v1787_v59, %v849_v53 }
 0x54d   : > { %v1791_v4 = vpop.eup %1790  ;;  %v878_v7 = vmul.f32 %v1789_v63, %v855_v45 }
 0x54e   : > { %v871_v13 = vmul.f32 %v1791_v4, %v852_v50  ;;  %v866_v14 = vsel %vm865_vm14, %v849_v53, %v864_v1 }
 0x54f   : > { %v880_v18 = vsel %vm879_vm0, %v855_v45, %v878_v7  ;;  %v869_v19 = vsel %vm867_vm2, %v868_v8, %v866_v14  ;;  %vm975_vm0 = vcmask 17408   ;;  %vm1025_vm2 = vcmask 7168  }
 0x550   : > { %v873_v23 = vsel %vm872_vm3, %v852_v50, %v871_v13  ;;  %v883_v26 = vsel %vm881_vm4, %v882_v17, %v880_v18  ;;  %v921_v27 = vrot.slane %v869_v19, %v920_v24  ;;  %vm1033_vm3 = vcmask 121856  }
 0x551   : > { %v876_v29 = vsel %vm874_vm5, %v875_v56, %v873_v23  ;;  %v931_v32 = vrot.slane %v883_v26, %v920_v24  ;;  %v1937_v26 = vmov 38   ;;  %vm1339_vm4 = vcmask 392192  }
 0x552   : > { %v927_v34 = vrot.slane %v876_v29, %v915_v22  ;;  %v923_v35 = vsel %vm922_vm12, %v921_v27, %v916_v28  ;;  %v1938_v27 = vmov 19   ;;  %v1939_v29 = vmov 18  }
 0x554   : > { %v932_v41 = vsel %vm922_vm12, %v931_v32, %v927_v34 }
 0x58c   : > { %v889_v54 = vpop.xlane.xlu1 %888 }
 0x58d   : > { %1792 = vrsqrt.f32 %v889_v54  ;;  %vm895_vm6 = vcmp.eq.f32.partialorder %v889_v54, inf  ;;  %v898_v31 = vand.u32 2147483648, %v889_v54  ;;  %vm897_vm13 = vcmp.eq.f32.partialorder %v889_v54, 0.0 }
 0x58e   : > { %v892_v55 = vpop.xlane.xlu0 %891 }
 0x58f   : > { %1794 = vrsqrt.f32 %v892_v55  ;;  %vm902_vm10 = vcmp.eq.f32.partialorder %v892_v55, inf  ;;  %v905_v37 = vand.u32 2147483648, %v892_v55  ;;  %vm904_vm14 = vcmp.eq.f32.partialorder %v892_v55, 0.0 }
 0x590   : > { %v967_v61 = vpop.xlane.xlu1 %966 }
 0x591   : > { %v968_v5 = vsub.f32 %v2208_v0, %v967_v61 }
 0x596   : > { %v985_v7 = vpop.permute.xlu0 %984 }
 0x59a   : > { %v1793_v11 = vpop.eup %1792 }
 0x59b   : > { %v894_v21 = vmul.f32 %v1793_v11, %v889_v54  ;;  %v969_v11 = vmul.f32 1.442695, %v968_v5 }
 0x59c   : > { %v1795_v16 = vpop.eup %1794 }
 0x59d   : > { %v901_v25 = vmul.f32 %v1795_v16, %v892_v55  ;;  %v896_v30 = vsel %vm895_vm6, %v889_v54, %v894_v21  ;;  %v960_v16 = vmul.f32 0.5, %v2208_v0 }
 0x59e   : > { %v899_v36 = vsel %vm897_vm13, %v898_v31, %v896_v30  ;;  %v1116_v30 = vsel %vm1115_vm1, %v2208_v0, -inf }
 0x59f   : > { %v903_v33 = vsel %vm902_vm10, %v892_v55, %v901_v25  ;;  %v936_v40 = vmul.f32 %v923_v35, %v899_v36  ;;  %v1940_v35 = vmov 20   ;;  %v1941_v36 = vmov 21  }
 0x5a0   : > { %v906_v38 = vsel %vm904_vm14, %v905_v37, %v903_v33 }
 0x5a1   : > { %v937_v42 = vmul.f32 %v932_v41, %v906_v38  ;;  %v938_v43 = vmax.f32 %v936_v40, 1e-08  ;;  %v944_v38 = vld [vmem:[#allocation5] sm:$0x3] }
 0x5a3   : > { %v939_v45 = vmax.f32 %v937_v42, 1e-08  ;;  %1796 = vrcp.f32 %v938_v43 }
 0x5a5   : > { %1798 = vrcp.f32 %v939_v45 }
 0x5a6   : > { %1800 = vpow2.f32 %v969_v11 }
 0x5a7   : > { %1802 = vtanh.f32 %v960_v16 }
 0x5b0   : > { %v1797_v50 = vpop.eup %1796 }
 0x5b2   : > { %v1799_v58 = vpop.eup %1798 }
 0x5b3   : > { %v1801_v14 = vpop.eup %1800 }
 0x5b4   : > { %v1803_v21 = vpop.eup %1802 }
 0x5b5   : > { %v962_v22 = vadd.f32 1.0, %v1803_v21 }
 0x5b7   : > { %v2253_v25 = vmul.f32 0.5, %v962_v22 }
 0x5b9   : > { %v1010_v28 = vsub.f32 1.0, %v2253_v25 }
 0x5c0   : > { %v757_v51 = vpop.f32.mrf.mxu1 }
 0x5c1   : > { %v942_v53 = vmul.f32 %v1797_v50, %v757_v51  ;;  %v2266_v51 = vadd.f32 1.0, %v2238_v44 }
 0x5c2   : > { %v1653_v59 = vpop.f32.mrf.mxu1  ;;  %v836_v54 = vpop.f32.mrf.mxu0 }
 0x5c3   : > { %v1135_v63 = vrot.slane %v942_v53, 1  ;;  %v943_v1 = vmul.f32 %v1799_v58, %v836_v54 }
 0x5c4   : > { %v1660_v2 = vpop.f32.mrf.mxu0 }
 0x5c5   : > { %v989_v55 = vrot.slane %v943_v1, 7  ;;  %v2245_v4 = vsel %vm933_vm15, %v943_v1, %v1135_v63 }
 0x5c7   : > { %v990_v8 = vsel %vm933_vm15, %v989_v55, %v942_v53 }
 0x5c8   : > { %v992_v10 = vmul.f32 %v990_v8, %v985_v7 }
 0x5ca   : > { %v993_v13 = vsel %vm886_vm11, %v992_v10, -inf }
 0x5cb   : > { %994 = vmax.xlane.f32.xlu1 %v993_v13 }
 0x5dc   : > { %972 = vrot.lane.b32.xlu1 %v1801_v14, %s1935_s13 }
 0x654   : > { %v995_v56 = vpop.xlane.xlu1 %994 }
 0x655   : > { %v996_v17 = vsub.f32 %v992_v10, %v995_v56 }
 0x657   : > { %v997_v18 = vmul.f32 1.442695, %v996_v17 }
 0x658   : > { %v973_v19 = vpop.permute.xlu1 %972 }
 0x659   : > { %1804 = vpow2.f32 %v997_v18  ;;  %v976_v20 = vsel %vm975_vm0, %v973_v19, 0.0 }
 0x65a   : > { %977 = vadd.xlane.f32.xlu1 %v976_v20 }
 0x666   : > { %v1805_v23 = vpop.eup %1804 }
 0x667   : > { %v999_v24 = vsel %vm886_vm11, %v1805_v23, 0.0 }
 0x668   : > { %1000 = vadd.xlane.f32.xlu0 %v999_v24 }
 0x66b   : > { %1006 = vperm.xlu1 %1761, %v2253_v25  }
 0x66f   : > { %1763 = vset.pattern.permute.xlu1 %v1937_v26 }
 0x670   : > { %1132 = vperm.xlu1 %1763, %v2238_v44   ;;  %v1947_v44 = vmov 39  }
 0x674   : > { %1765 = vset.pattern.permute.xlu1 %v1938_v27 }
 0x67e   : > { %1013 = vperm.xlu0 %1762, %v1010_v28  }
 0x682   : > { %1764 = vset.pattern.permute.xlu0 %v1939_v29 }
 0x694   : > { %1117 = vmax.xlane.f32.xlu1 %v1116_v30 }
 0x6e3   : > { %v978_v31 = vpop.xlane.xlu1 %977 }
 0x6e4   : > { %1806 = vrcp.f32 %v978_v31 }
 0x6e7   : > { %v1007_v42 = vpop.permute.xlu1 %1006 }
 0x6eb   : > { %v1133_v53 = vpop.permute.xlu1 %1132 }
 0x6ec   : > { %v1138_v61 = vmul.f32 %v2245_v4, %v1133_v53 }
 0x6ee   : > { %v1139_v63 = vsel %vm886_vm11, %v1138_v61, -inf }
 0x6f1   : > { %v1807_v32 = vpop.eup %1806  ;;  %v1001_v33 = vpop.xlane.xlu0 %1000 }
 0x6f2   : > { %1808 = vrcp.f32 %v1001_v33  ;;  %v980_v34 = vmul.f32 %v1807_v32, %v1801_v14 }
 0x6f4   : > { %1042 = vperm.xlu1 %1765, %v980_v34   ;;  %1037 = vperm.xlu0 %1764, %v980_v34  }
 0x6f8   : > { %1766 = vset.pattern.permute.xlu0 %v1940_v35  ;;  %1769 = vset.pattern.permute.xlu1 %v1947_v44  ;;  %v1949_v35 = vmov 43  }
 0x6f9   : > { %1048 = vperm.xlu0 %1766, %v980_v34   ;;  %v1014_v40 = vpop.permute.xlu0 %1013  ;;  %v1948_v34 = vmov 40  }
 0x6fa   : > { %v1016_v45 = vmul.f32 %v1014_v40, %v944_v38 }
 0x6fd   : > { %1767 = vset.pattern.permute.xlu0 %v1941_v36 }
 0x6ff   : > { %v1809_v37 = vpop.eup %1808 }
 0x700   : > { %v1003_v41 = vmul.f32 %v1809_v37, %v1805_v23 }
 0x702   : > { %v1009_v43 = vmul.f32 %v1007_v42, %v1003_v41 }
 0x704   : > { %v1017_v50 = vadd.f32 %v1016_v45, %v1009_v43 }
 0x706   : > { %1022 = vrot.lane.b32.xlu1 %v1017_v50, %s1942_s14  ;;  %1019 = vrot.lane.b32.xlu0 %v1017_v50, %s1943_s15 }
 0x70a   : > { %1030 = vrot.lane.b32.xlu1 %v1017_v50, %s1944_s24  ;;  %1027 = vrot.lane.b32.xlu0 %v1017_v50, %s1945_s25 }
 0x70e   : > { %1058 = vperm.xlu0 %1767, %v2266_v51  }
 0x712   : > { %1768 = vset.pattern.permute.xlu0 %v1947_v44 }
 0x71d   : > { %v1118_v58 = vpop.xlane.xlu1 %1117 }
 0x71e   : > { %v1119_v59 = vsub.f32 %v2208_v0, %v1118_v58  ;;  %v1950_v58 = vmov 41  }
 0x720   : > { %v1120_v54 = vmul.f32 1.442695, %v1119_v59  ;;  %v1951_v59 = vmov 42  }
 0x722   : > { %1810 = vpow2.f32 %v1120_v54 }
 0x72e   : > { %1140 = vmax.xlane.f32.xlu1 %v1139_v63 }
 0x72f   : > { %v2272_v1 = vpop.eup %1810 }
 0x730   : > { %1123 = vrot.lane.b32.xlu0 %v2272_v1, %s1946_s26  ;;  %s1952_s26 = smov 84  }
 0x76f   : > { %v1038_v2 = vpop.permute.xlu0 %1037  ;;  %v1043_v55 = vpop.permute.xlu1 %1042 }
 0x770   : > { %v1045_v10 = vmul.f32 %v1043_v55, %v1017_v50 }
 0x774   : > { %v1049_v5 = vpop.permute.xlu0 %1048 }
 0x778   : > { %v1020_v0 = vpop.permute.xlu0 %1019  ;;  %v1023_v7 = vpop.permute.xlu1 %1022 }
 0x779   : > { %v1026_v8 = vsel %vm1025_vm2, %v1020_v0, %v1023_v7  ;;  %v1330_v7 = vld [vmem:[%s2448_s7 + $0x20] sm:$0xff] }
 0x77a   : > { %v1040_v4 = vmul.f32 %v1038_v2, %v1026_v8  ;;  %v1329_v8 = vld [vmem:[%s2448_s7 + $0x18] sm:$0xff] }
 0x77c   : > { %v1028_v11 = vpop.permute.xlu0 %1027  ;;  %v1031_v13 = vpop.permute.xlu1 %1030  ;;  %v1046_v15 = vadd.f32 %v1045_v10, %v1040_v4  ;;  %v1327_v4 = vld [vmem:[%s2448_s7 + $0x8] sm:$0xff] }
 0x77d   : > { %v1034_v14 = vsel %vm1033_vm3, %v1028_v11, %v1031_v13 }
 0x77e   : > { %v1051_v16 = vmul.f32 %v1049_v5, %v1034_v14 }
 0x780   : > { %v1052_v56 = vadd.f32 %v1051_v16, %v1046_v15 }
 0x782   : > { %v1053_v17 = vmax.f32 %v1052_v56, 1e-16 }
 0x784   : > { %1812 = vlog2.f32 %v1053_v17 }
 0x789   : > { %v1059_v20 = vpop.permute.xlu0 %1058 }
 0x791   : > { %v1813_v18 = vpop.eup %1812 }
 0x792   : > { %v1055_v19 = vmul.f32 0.6931472, %v1813_v18 }
 0x794   : > { %v1061_v21 = vmul.f32 %v1059_v20, %v1055_v19 }
 0x796   : > { %v1062_v22 = vmul.f32 1.442695, %v1061_v21 }
 0x798   : > { %1814 = vpow2.f32 %v1062_v22 }
 0x7a2   : > { %v1124_v23 = vpop.permute.xlu0 %1123 }
 0x7a3   : > { %v1126_v24 = vsel %vm975_vm0, %v1124_v23, 0.0 }
 0x7a4   : > { %1127 = vadd.xlane.f32.xlu1 %v1126_v24 }
 0x7a5   : > { %v1815_v26 = vpop.eup %1814 }
 0x7a6   : > { %v1064_v27 = vsel %vm886_vm11, %v1815_v26, 0.0 }
 0x7a7   : > { %1065 = vadd.xlane.f32.xlu0 %v1064_v27 }
 0x7b7   : > { %v1141_v29 = vpop.xlane.xlu1 %1140 }
 0x7b8   : > { %v1142_v30 = vsub.f32 %v1138_v61, %v1141_v29  ;;  %v1114_v61 = vld [vmem:[#allocation6] sm:$0x3]  ;;  %v1326_v29 = vld [vmem:[%s2448_s7] sm:$0xff] }
 0x7ba   : > { %v1143_v31 = vmul.f32 1.442695, %v1142_v30 }
 0x7bc   : > { %1816 = vpow2.f32 %v1143_v31 }
 0x7bd   : > { %1151 = vperm.xlu0 %1768, %v2253_v25  }
 0x7c1   : > { %1773 = vset.pattern.permute.xlu0 %v1949_v35 }
 0x7c9   : > { %v1817_v32 = vpop.eup %1816 }
 0x7ca   : > { %v1145_v33 = vsel %vm886_vm11, %v1817_v32, 0.0 }
 0x7cb   : > { %1146 = vadd.xlane.f32.xlu1 %v1145_v33 }
 0x7dc   : > { %1156 = vperm.xlu1 %1769, %v1010_v28   ;;  %v1083_v28 = vsub.s32 1, %v2198_v60 }
 0x7e0   : > { %1770 = vset.pattern.permute.xlu1 %v1948_v34 }
 0x82d   : > { %v1128_v40 = vpop.xlane.xlu1 %1127 }
 0x830   : > { %v1066_v36 = vpop.xlane.xlu0 %1065 }
 0x831   : > { %v1067_v37 = vadd.f32 1e-16, %v1066_v36 }
 0x833   : > { %1818 = vrcp.f32 %v1067_v37 }
 0x834   : > { %1820 = vrcp.f32 %v1128_v40 }
 0x838   : > { %v1152_v2 = vpop.permute.xlu0 %1151 }
 0x840   : > { %v1819_v38 = vpop.eup %1818 }
 0x841   : > { %v2283_v41 = vmul.f32 %v1819_v38, %v1815_v26  ;;  %v1821_v45 = vpop.eup %1820 }
 0x842   : > { %v1130_v50 = vmul.f32 %v1821_v45, %v2272_v1  ;;  %v1331_v1 = vld [vmem:[%s2448_s7 + $0x28] sm:$0xff] }
 0x843   : > { %v1073_v42 = vrot.slane %v2283_v41, %v2213_v3  ;;  %1428 = vst.msk [vmem:[#allocation5] sm:$0x3] %vm886_vm11, %v2283_v41  ;;  %v1084_v43 = vrot.slane %v2283_v41, %v1083_v28  ;;  %1662 = vmatpush3.msra.mxu1 %v1331_v1 }
 0x844   : > { %1663 = vmatprep.subr.mxu1 %v1927_v12 }
 0x845   : > { %1075 = vbcast.lane.b32.xlu1 %v1073_v42, 256  ;;  %1664 = vmatpush3.msra.mxu1 %v1330_v7 }
 0x846   : > { %1665 = vmatprep.subr.mxu1 %v1927_v12 }
 0x847   : > { %1666 = vmatpush3.msra.mxu1 %v1329_v8 }
 0x848   : > { %1667 = vmatprep.subr.mxu1 %v1927_v12 }
 0x849   : > { %1079 = vbcast.lane.b32.xlu1 %v1073_v42, 264 }
 0x84d   : > { %1086 = vbcast.lane.b32.xlu1 %v1084_v43, 256 }
 0x851   : > { %1090 = vbcast.lane.b32.xlu1 %v1084_v43, 264 }
 0x854   : > { %v1147_v53 = vpop.xlane.xlu1 %1146 }
 0x855   : > { %1822 = vrcp.f32 %v1147_v53  ;;  %1178 = vperm.xlu1 %1770, %v1130_v50  }
 0x858   : > { %v1157_v63 = vpop.permute.xlu1 %1156 }
 0x859   : > { %1771 = vset.pattern.permute.xlu1 %v1950_v58  ;;  %v1159_v5 = vmul.f32 %v1157_v63, %v1114_v61 }
 0x85a   : > { %1183 = vperm.xlu1 %1771, %v1130_v50  }
 0x85e   : > { %1772 = vset.pattern.permute.xlu1 %v1951_v59 }
 0x85f   : > { %1189 = vperm.xlu1 %1772, %v1130_v50  }
 0x862   : > { %v1823_v54 = vpop.eup %1822 }
 0x863   : > { %v1149_v44 = vmul.f32 %v1823_v54, %v1817_v32 }
 0x865   : > { %v1154_v55 = vmul.f32 %v1152_v2, %v1149_v44 }
 0x867   : > { %v1160_v0 = vadd.f32 %v1159_v5, %v1154_v55 }
 0x869   : > { %1165 = vrot.lane.b32.xlu1 %v1160_v0, %s1942_s14  ;;  %1162 = vrot.lane.b32.xlu0 %v1160_v0, %s1943_s15  ;;  %s2463_s14 = scalar_lea.vmem [#allocation8], %s2076_s30  ;;  %s1953_s15 = smov 68  }
 0x86d   : > { %1172 = vrot.lane.b32.xlu1 %v1160_v0, %s1944_s24  ;;  %1169 = vrot.lane.b32.xlu0 %v1160_v0, %s1945_s25  ;;  %s1954_s24 = smov 96   ;;  %s1955_s25 = smov (!%p1586_p12), 48  }
 0x871   : > { %1198 = vperm.xlu0 %1773, %v2266_v51   ;;  %v1328_v51 = vld [vmem:[%s2448_s7 + $0x10] sm:$0xff] }
 0x872   : > { %1668 = vmatpush3.msra.mxu1 %v1328_v51 }
 0x873   : > { %1669 = vmatprep.subr.mxu1 %v1927_v12 }
 0x874   : > { %1670 = vmatpush3.msra.mxu1 %v1327_v4 }
 0x875   : > { %1671 = vmatprep.subr.mxu1 %v1927_v12 }
 0x876   : > { %1672 = vmatpush3.msra.mxu1 %v1326_v29 }
 0x8b7   : > { %v1076_v10 = vpop.permute.xlu1 %1075 }
 0x8b8   : > { %v1092_v11 = vmul.f32 %v1076_v10, %v2194_v57 }
 0x8ba   : > { %v1096_v15 = vsel %vm681_vm9, %v1092_v11, 0.0 }
 0x8bb   : > { %v1080_v13 = vpop.permute.xlu1 %1079 }
 0x8bc   : > { %v1093_v14 = vmul.f32 %v1080_v13, %v2180_v48 }
 0x8be   : > { %v1097_v16 = vsel %vm681_vm9, %v1093_v14, 0.0 }
 0x8bf   : > { %v1098_v56 = vadd.f32 %v1097_v16, %v1096_v15  ;;  %v1087_v17 = vpop.permute.xlu1 %1086 }
 0x8c0   : > { %v1094_v19 = vmul.f32 %v1087_v17, %v2186_v52 }
 0x8c1   : > { %v1099_v18 = vrot.slane %v1098_v56, 4 }
 0x8c2   : > { %v1105_v12 = vsel %vm681_vm9, %v1094_v19, 0.0 }
 0x8c3   : > { %v1100_v20 = vadd.f32 %v1099_v18, %v1098_v56  ;;  %v1091_v21 = vpop.permute.xlu1 %1090  ;;  %v1584_v18 = vld [vmem:[%s2449_s8] ss:$0 sm:$0xff] }
 0x8c4   : > { %v1095_v22 = vmul.f32 %v1091_v21, %v2182_v49 }
 0x8c5   : > { %v1101_v24 = vrot.slane %v1100_v20, 2 }
 0x8c6   : > { %v1106_v23 = vsel %vm681_vm9, %v1095_v22, 0.0 }
 0x8c7   : > { %v1107_v26 = vadd.f32 %v1106_v23, %v1105_v12  ;;  %v1102_v30 = vadd.f32 %v1101_v24, %v1100_v20  ;;  %v1238_v12 = vrot.slane %v2253_v25, %v2206_v62 }
 0x8c9   : > { %v1108_v27 = vrot.slane %v1107_v26, 4  ;;  %v1103_v34 = vrot.slane %v1102_v30, 1  ;;  %v1246_v23 = vrot.slane %v1238_v12, %v2206_v62  ;;  %v1239_v24 = vcombine.high %v1238_v12, %v1238_v12 }
 0x8cb   : > { %v1109_v31 = vadd.f32 %v1108_v27, %v1107_v26  ;;  %v1104_v37 = vadd.f32 %v1103_v34, %v1102_v30 }
 0x8cd   : > { %v1110_v32 = vrot.slane %v1109_v31, 2 }
 0x8cf   : > { %v1111_v33 = vadd.f32 %v1110_v32, %v1109_v31  ;;  %v1253_v32 = vrot.slane %v1239_v24, %v2206_v62 }
 0x8d0   : > { %v1179_v35 = vpop.permute.xlu1 %1178 }
 0x8d1   : > { %v1112_v36 = vrot.slane %v1111_v33, 1 }
 0x8d3   : > { %v1113_v38 = vadd.f32 %v1112_v36, %v1111_v33  ;;  %v1261_v36 = vrot.slane %v1253_v32, %v2213_v3 }
 0x8d5   : > { %v1184_v40 = vpop.permute.xlu1 %1183  ;;  %v2331_v42 = vsel %vm933_vm15, %v1113_v38, %v1104_v37 }
 0x8d6   : > { %1322 = vrot.lane.b32.xlu1 %v2331_v42, %s1931_s16  ;;  %1420 = vst.msk [vmem:[#allocation2] sm:$0x3] %vm886_vm11, %v2331_v42  ;;  %v1186_v59 = vmul.f32 %v1184_v40, %v1160_v0 }
 0x8da   : > { %v1190_v43 = vpop.permute.xlu1 %1189 }
 0x8db   : > { %v1163_v45 = vpop.permute.xlu0 %1162 }
 0x8de   : > { %v1166_v50 = vpop.permute.xlu1 %1165 }
 0x8df   : > { %v1168_v53 = vsel %vm1025_vm2, %v1163_v45, %v1166_v50  ;;  %v1170_v54 = vpop.permute.xlu0 %1169 }
 0x8e0   : > { %v1181_v58 = vmul.f32 %v1179_v35, %v1168_v53 }
 0x8e2   : > { %v1173_v61 = vpop.permute.xlu1 %1172  ;;  %v1187_v44 = vadd.f32 %v1186_v59, %v1181_v58 }
 0x8e3   : > { %v1175_v63 = vsel %vm1033_vm3, %v1170_v54, %v1173_v61 }
 0x8e4   : > { %v1192_v2 = vmul.f32 %v1190_v43, %v1175_v63 }
 0x8e6   : > { %v1193_v55 = vadd.f32 %v1192_v2, %v1187_v44 }
 0x8e8   : > { %v1194_v5 = vmax.f32 %v1193_v55, 1e-16 }
 0x8ea   : > { %1824 = vlog2.f32 %v1194_v5 }
 0x8ec   : > { %v1199_v8 = vpop.permute.xlu0 %1198 }
 0x8f7   : > { %v1825_v1 = vpop.eup %1824 }
 0x8f8   : > { %v1196_v7 = vmul.f32 0.6931472, %v1825_v1 }
 0x8fa   : > { %v1201_v51 = vmul.f32 %v1199_v8, %v1196_v7 }
 0x8fc   : > { %v1202_v4 = vmul.f32 1.442695, %v1201_v51 }
 0x8fe   : > { %1826 = vpow2.f32 %v1202_v4 }
 0x90b   : > { %v1827_v10 = vpop.eup %1826 }
 0x90c   : > { %v1204_v11 = vsel %vm886_vm11, %v1827_v10, 0.0 }
 0x90d   : > { %1205 = vadd.xlane.f32.xlu1 %v1204_v11 }
 0x948   : > { %v1323_v0 = vpop.permute.xlu1 %1322 }
 0x949   : > { %v1325_v13 = vsel %vm560_vm8, %v2172_v47, %v1323_v0  ;;  %vm1417_vm8 = vcmask 58368  }
 0x94a   : > { %1674 = vmatmul.mubr.msk.f32.vlgmr.msra.gmra.mxu1 %vm1339_vm4, %v1325_v13 }
 0x996   : > { %v1206_v14 = vpop.xlane.xlu1 %1205 }
 0x997   : > { %v1207_v15 = vadd.f32 1e-16, %v1206_v14 }
 0x999   : > { %1828 = vrcp.f32 %v1207_v15 }
 0x9a6   : > { %v1829_v16 = vpop.eup %1828 }
 0x9a7   : > { %v2343_v56 = vmul.f32 %v1829_v16, %v1827_v10 }
 0x9a9   : > { %v1213_v17 = vrot.slane %v2343_v56, %v2213_v3  ;;  %1429 = vst.msk [vmem:[#allocation6] sm:$0x3] %vm886_vm11, %v2343_v56  ;;  %v1224_v47 = vrot.slane %v2343_v56, %v1083_v28  ;;  %v1257_v28 = vrot.slane %v1246_v23, %v2213_v3 }
 0x9ab   : > { %1215 = vbcast.lane.b32.xlu0 %v1213_v17, 256 }
 0x9af   : > { %1219 = vbcast.lane.b32.xlu0 %v1213_v17, 264 }
 0x9b3   : > { %1226 = vbcast.lane.b32.xlu0 %v1224_v47, 256 }
 0x9b7   : > { %1230 = vbcast.lane.b32.xlu0 %v1224_v47, 264 }
 0xa0a   : > { %v1409_v19 = vpop.f32.mrf.mxu1 }
 0xa0b   : > { %v1410_v20 = vadd.f32 %v1584_v18, %v1409_v19 }
 0xa0c   : > { %v1675_v21 = vpop.f32.mrf.mxu1 }
 0xa0d   : > { %v1413_v22 = vmul.f32 0.5, %v1410_v20 }
 0xa0f   : > { %1830 = vtanh.f32 %v1413_v22 }
 0xa1c   : > { %v1831_v60 = vpop.eup %1830 }
 0xa1d   : > { %v1415_v26 = vadd.f32 1.0, %v1831_v60  ;;  %v1216_v27 = vpop.permute.xlu0 %1215 }
 0xa1e   : > { %v1264_v29 = vmul.f32 %v1257_v28, %v1216_v27  ;;  %v1294_v50 = vmul.f32 %v1216_v27, %v2217_v6 }
 0xa1f   : > { %v1416_v30 = vmul.f32 0.5, %v1415_v26 }
 0xa20   : > { %v1268_v31 = vsub.f32 1.0, %v1264_v29 }
 0xa21   : > { %1418 = vst.msk [vmem:[%s2463_s14] sm:$0x3] %vm1417_vm8, %v1416_v30  ;;  %v1220_v33 = vpop.permute.xlu0 %1219 }
 0xa22   : > { %v1265_v34 = vmul.f32 %v1257_v28, %v1220_v33  ;;  %v1295_v25 = vmul.f32 %v1220_v33, %v2217_v6  ;;  %1276 = vrot.lane.b32.xlu0 %v1268_v31, %s1952_s26 }
 0xa24   : > { %v1269_v35 = vsub.f32 1.0, %v1265_v34  ;;  %1304 = vrot.lane.b32.xlu1 %v1295_v25, %s1953_s15 }
 0xa25   : > { %v1227_v37 = vpop.permute.xlu0 %1226 }
 0xa26   : > { %v1266_v38 = vmul.f32 %v1261_v36, %v1227_v37  ;;  %1278 = vrot.lane.b32.xlu0 %v1269_v35, %s1952_s26  ;;  %v1296_v53 = vmul.f32 %v1227_v37, %v2222_v9 }
 0xa28   : > { %v1270_v40 = vsub.f32 1.0, %v1266_v38 }
 0xa29   : > { %v1231_v43 = vpop.permute.xlu0 %1230 }
 0xa2a   : > { %v1267_v45 = vmul.f32 %v1261_v36, %v1231_v43  ;;  %1280 = vrot.lane.b32.xlu0 %v1270_v40, %s1952_s26  ;;  %v1297_v58 = vmul.f32 %v1231_v43, %v2222_v9 }
 0xa2c   : > { %v1271_v62 = vsub.f32 1.0, %v1267_v45 }
 0xa2e   : > { %1282 = vrot.lane.b32.xlu0 %v1271_v62, %s1952_s26 }
 0xa32   : > { %1302 = vrot.lane.b32.xlu0 %v1294_v50, %s1953_s15 }
 0xa36   : > { %1306 = vrot.lane.b32.xlu0 %v1296_v53, %s1953_s15 }
 0xa3a   : > { %1308 = vrot.lane.b32.xlu0 %v1297_v58, %s1953_s15 }
 0xa3e   : > { %1424 = vrot.lane.b32.xlu0 %v2148_v39, %s1954_s24 }
 0xa94   : > { %v1277_v3 = vpop.permute.xlu0 %1276 }
 0xa95   : > { %v1288_v2 = vmul.f32 %v1277_v3, %v2194_v57 }
 0xa96   : > { %v1305_v61 = vpop.permute.xlu1 %1304 }
 0xa98   : > { %v1279_v59 = vpop.permute.xlu0 %1278 }
 0xa99   : > { %v1289_v54 = vmul.f32 %v1279_v59, %v2180_v48 }
 0xa9b   : > { %v1315_v63 = vadd.f32 %v1305_v61, %v1289_v54 }
 0xa9c   : > { %v1281_v44 = vpop.permute.xlu0 %1280 }
 0xa9d   : > { %1431 = vst.msk [vmem:[#allocation7 + $0x8] sm:$0xff] %vm681_vm9, %v1315_v63  ;;  %v1290_v9 = vmul.f32 %v1281_v44, %v2186_v52 }
 0xaa0   : > { %v1283_v6 = vpop.permute.xlu0 %1282 }
 0xaa1   : > { %v1291_v8 = vmul.f32 %v1283_v6, %v2182_v49 }
 0xaa4   : > { %v1303_v55 = vpop.permute.xlu0 %1302 }
 0xaa5   : > { %v1314_v5 = vadd.f32 %v1303_v55, %v1288_v2 }
 0xaa7   : > { %1430 = vst.msk [vmem:[#allocation7] sm:$0xff] %vm681_vm9, %v1314_v5 }
 0xaa8   : > { %v1307_v1 = vpop.permute.xlu0 %1306 }
 0xaa9   : > { %v1316_v7 = vadd.f32 %v1307_v1, %v1290_v9 }
 0xaab   : > { %1432 = vst.msk [vmem:[#allocation7 + $0x10] sm:$0xff] %vm681_vm9, %v1316_v7 }
 0xaac   : > { %v1309_v48 = vpop.permute.xlu0 %1308 }
 0xaad   : > { %v1317_v51 = vadd.f32 %v1309_v48, %v1291_v8  ;;  %1437 = sbr.rel (%p1586_p12) target bundleno = 2861 (0xb2d), region = 64 }
 0xaaf   : > { %1433 = vst.msk [vmem:[#allocation7 + $0x18] sm:$0xff] %vm681_vm9, %v1317_v51 }
 0xab0   : > { %v1425_v4 = vpop.permute.xlu0 %1424 }
 0xab1   : > { %1427 = vst.msk [vmem:[#allocation4] sm:$0x3] %vm1421_vm7, %v1425_v4 }
 0xab2   : > { %1460 = vst.msk [vmem:[#allocation10] sm:$0xff] %vm681_vm9, %v1314_v5  ;;  %1461 = vst.msk [vmem:[#allocation10 + $0x8] sm:$0xff] %vm681_vm9, %v1315_v63  ;;  %1438 = vrot.lane.b32.xlu0 %v2168_v46, %s1955_s25  ;;  %1445 = vrot.lane.b32.xlu1 %v2283_v41, %s1956_s19  ;;  %vm1454_vm7 = vcmask 654336   ;;  %vm1456_vm11 = vcmask 785408   ;;  %vm1458_vm5 = vcmask 910336  }
 0xab3   : > { %1462 = vst.msk [vmem:[#allocation10 + $0x10] sm:$0xff] %vm681_vm9, %v1316_v7  ;;  %1463 = vst.msk [vmem:[#allocation10 + $0x18] sm:$0xff] %vm681_vm9, %v1317_v51 }
 0xab6   : > { %1441 = vrot.lane.b32.xlu0 %v2148_v39, %s1957_s22  ;;  %1449 = vrot.lane.b32.xlu1 %v2343_v56, %s1958_s12 }
 0xb24   : > { %v1439_v49 = vpop.permute.xlu0 %1438  ;;  %v1446_v52 = vpop.permute.xlu1 %1445 }
 0xb25   : > { %v1452_v57 = vsel %vm681_vm9, %v2331_v42, %v1439_v49 }
 0xb28   : > { %v1442_v10 = vpop.permute.xlu0 %1441  ;;  %v1450_v11 = vpop.permute.xlu1 %1449 }
 0xb29   : > { %v1453_v46 = vsel %vm1339_vm4, %v1452_v57, %v1442_v10 }
 0xb2a   : > { %v1455_v0 = vsel %vm1454_vm7, %v1453_v46, %v1446_v52 }
 0xb2b   : > { %v1457_v41 = vsel %vm1456_vm11, %v1455_v0, %v1450_v11 }
 0xb2c   : > { %1459 = vst.msk [vmem:[%s2451_s10] sm:$0x3] %vm1458_vm5, %v1457_v41 }
 0xb2d PF: > { %s1588_s14 = sshll.u32 %s2043_s21, 5  ;;  %s2464_s25 = scalar_lea.vmem [#allocation8], %s2076_s30 }
 0xb2e   : > { %s1476_s24 = scalar_lea.hbm %s2450_s9, %s1588_s14  ;;  %s1478_s19 = sshll.u32 %s2464_s25, 4  ;;  %s1479_s19 = int_to_ptr.vmem [resolvable:$true] %s1478_s19 }
 0xb2f   : > { %s2465_s22 = sand.u32 1, %s1912_s18   ;;  %s1832_s29 = scalar_lea.vmem %s1479_s19, 32 }
 0xb30   : > { %s1465_s12 = scalar_lea.sflag [#allocation9], %s2465_s22  ;;  %p1833_p13 = scmp.ne.s32.totalorder %s1479_s19, %s1832_s29 }
 0xb31   : > { %s1959_s16 = smov [#allocation8]  }
 0xb32   : > { %p1834_p0 = pnand %p1833_p13, %p2062_p5  ;;  %s1836_s13 = sshll.u32 %s1959_s16, 4  ;;  %s1837_s13 = int_to_ptr.vmem [resolvable:$false] %s1836_s13 }
 0xb33   : > { %s1838_s0 = scalar_lea.vmem %s1837_s13, 64  ;;  %p1839_p3 = scmp.lt.s32.totalorder %s1479_s19, %s1837_s13 }
 0xb34   : > { %p1835_p1 = pneg %p1834_p0  ;;  %p1840_p4 = scmp.lt.s32.totalorder %s1838_s0, %s1832_s29 }
 0xb36   : > { %p1841_p7 = por %p1840_p4, %p1839_p3 }
 0xb38   : > { %p1842_p8 = pnand %p1841_p7, %p1835_p1 }
 0xb3a   : > { %1845 = shalt.err (!%p1842_p8)
}
 0xb3b   : > { %s1846_s14 = scalar_lea.hbm %s1476_s24, 32  ;;  %s1850_s15 = scalar_lea.hbm %s2450_s9, 256 }
 0xb3c   : > { %p1847_p9 = scmp.ne.s32.totalorder %s1476_s24, %s1846_s14  ;;  %p1851_p12 = scmp.lt.s32.totalorder %s1476_s24, %s2450_s9 }
 0xb3d   : > { %p1852_p13 = scmp.lt.s32.totalorder %s1850_s15, %s1846_s14 }
 0xb3e   : > { %p1848_p10 = pnand %p1847_p9, %p2062_p5 }
 0xb3f   : > { %p1853_p0 = por %p1852_p13, %p1851_p12 }
 0xb40   : > { %p1849_p11 = pneg %p1848_p10 }
 0xb42   : > { %p1854_p2 = pnand %p1853_p0, %p1849_p11 }
 0xb44   : > { %1857 = shalt.err (!%p1854_p2)
}
 0xb45   : > { %1676 = dma.vmem_to_hbm [thread:$0]  (%p2062_p5), %s1479_s19, 32, %s1476_s24, %s1465_s12  }
 0xb46   : > { %s1960_s0 = smov [#allocation10]   ;;  %p2466_p3 = scmp.eq.s32.totalorder %s2043_s21, 7 }
 0xb47   : > { %s1491_s29 = sshll.u32 %s1960_s0, 4  ;;  %s1492_s29 = int_to_ptr.vmem [resolvable:$true] %s1491_s29 }
 0xb48   : > { %s1858_s16 = scalar_lea.vmem %s1492_s29, 512  ;;  %p1865_p8 = scmp.lt.s32.totalorder %s1492_s29, %s1492_s29 }
 0xb49   : > { %p1859_p1 = scmp.ne.s32.totalorder %s1492_s29, %s1858_s16  ;;  %p1866_p9 = scmp.lt.s32.totalorder %s1858_s16, %s1858_s16 }
 0xb4b   : > { %p1860_p4 = pnand %p1859_p1, %p2466_p3  ;;  %p1867_p10 = por %p1866_p9, %p1865_p8 }
 0xb4d   : > { %p1861_p7 = pneg %p1860_p4 }
 0xb4f   : > { %p1868_p6 = pnand %p1867_p10, %p1861_p7 }
 0xb51   : > { %1871 = shalt.err (!%p1868_p6)
}
 0xb52   : > { %s1961_s13 = smov 128   ;;  %p2467_p2 = pmov %p2466_p3 }
 0xb53   : > { %s2468_s14 = smov 8  }
 0xb54   : > { %1678 = dma.vmem_to_hbm [thread:$0]  (%p2467_p2), %s1492_s29, 512, %s2452_s11, [#allocation11], %s1961_s13, %s1961_s13, %s2468_s14  }
 0xb55   : > { %p2469_p5 = pmov %p2467_p2 }
 0xb56   : > { %p2470_p11 = pmov %p2467_p2 }
 0xb57   : > { %1899 = dma.done.wait (%p2469_p5), [#allocation11], 512  }
 0xb58   : > { %1901 = vsyncadd (%p2470_p11), [#allocation11], 4294966784 }
 0xb59 PF: > { %p1688_p12 = scmp.ge.s32.totalorder %s1920_s20, 2  ;;  %s1513_s24 = sand.u32 1, %s1908_s17  }
 0xb5a   : > { %p2471_p6 = scmp.ne.s32.totalorder %s2461_s28, 0  ;;  %s1514_s19 = scalar_lea.sflag [#allocation9], %s1513_s24 }
 0xb5c   : > { %p1683_p13 = pnand %p1688_p12, %p2471_p6 }
 0xb5e   : > { %p1684_p0 = pneg %p1683_p13 }
 0xb60   : > { %1903 = dma.done.wait (%p1684_p0), %s1514_s19, 32  }
 0xb61   : > { %1905 = vsyncadd (%p1684_p0), %s1514_s19, 4294967264  ;;  %s2472_s12 = sld [smem:[#allocation14_spill]]  ;;  %p23_p1 = scmp.ge.s32.totalorder %s2047_s23, 10  }
 0xb62   : > { %s2473_s19 = sld [smem:[#allocation15_spill]]  ;;  %s2474_s17 = smov %s1912_s18 }
 0xb63   : > { %s2476_s20 = smov %s2047_s23  ;;  %25 = sbr.rel (!%p23_p1) target bundleno = 6 (0x6), region = 115 }
 0xb67   : > { %s2475_s18 = smov %s2472_s12 }
 0xb68   :  { %1519 = vsyncpa [#allocation9], 1 }
 0xb69   :  { %1521 = vsyncpa [#allocation9 + $0x1], 1 }
 0xb6a   :  { %1522 = vsyncpa [#allocation11], 1 }

</bundles_post_ra>
